<compile_context>
chip_gen: v7x
topology: tpu7x:2x2x1
jax: 0.10.0
libtpu: 0.0.40
codegen_flags: <defaults>
</compile_context>

<pallas_src>
import jax
import jax.numpy as jnp
from jax.experimental import pallas as pl
from jax.experimental.pallas import tpu as pltpu


# ----------------------------------------------------------------------------
# Fused DoubleConv kernel: (conv3x3 pad=1 -> BN -> ReLU) x 2, one batch element
# ----------------------------------------------------------------------------
def _double_conv_kernel(x2_ref, x1_ref, ma_ref, mb_ref, mc_ref,
                        s1_ref, b1_ref, s2_ref, b2_ref, o_ref):
    # x2_ref: (H, W*C2)    skip-connection image, W and C flattened onto lanes
    # x1_ref: (H, W*C1)    upsampled low-res image (same flattening)
    # ma_ref: (3, W*C2,  W*Cmid)  banded conv1 weights for the x2 channels
    # mb_ref: (3, W*C1,  W*Cmid)  banded conv1 weights for the x1 channels
    # mc_ref: (3, W*Cmid, W*Cout) banded conv2 weights
    # s*/b*:  (1, W*C)            folded eval-mode BatchNorm scale / bias
    # o_ref:  (H, W*Cout)
    H = o_ref.shape[0]

    # Shift matrices for the dy taps (folds the H zero-padding into the MXU):
    #   (d_up @ p)[h] = p[h-1],  (d_dn @ p)[h] = p[h+1],  zero outside [0, H).
    r = jax.lax.broadcasted_iota(jnp.int32, (H, H), 0)
    c = jax.lax.broadcasted_iota(jnp.int32, (H, H), 1)
    d_up = jnp.where(c == r - 1, 1.0, 0.0)
    d_dn = jnp.where(c == r + 1, 1.0, 0.0)

    def combine(p0, p1, p2):
        # out[h] = p0[h-1] + p1[h] + p2[h+1]
        return (p1
                + jnp.dot(d_up, p0, preferred_element_type=jnp.float32)
                + jnp.dot(d_dn, p2, preferred_element_type=jnp.float32))

    x2 = x2_ref[...]
    x1 = x1_ref[...]

    # conv1: split-weight accumulation over the (never materialized) concat.
    p = [jnp.dot(x2, ma_ref[dy], preferred_element_type=jnp.float32)
         + jnp.dot(x1, mb_ref[dy], preferred_element_type=jnp.float32)
         for dy in range(3)]
    h = combine(p[0], p[1], p[2])
    h = jnp.maximum(h * s1_ref[...] + b1_ref[...], 0.0)          # BN1 + ReLU

    # conv2 on the in-register intermediate (never written to HBM).
    q = [jnp.dot(h, mc_ref[dy], preferred_element_type=jnp.float32)
         for dy in range(3)]
    y = combine(q[0], q[1], q[2])
    y = jnp.maximum(y * s2_ref[...] + b2_ref[...], 0.0)          # BN2 + ReLU

    o_ref[...] = y.astype(o_ref.dtype)


# ----------------------------------------------------------------------------
# Weight / BN preprocessing (wrapper side, tiny, done once)
# ----------------------------------------------------------------------------
def _band_weights(w_oihw, W):
    """(Cout, Cin, 3, 3) PyTorch weights -> (3, W*Cin, W*Cout) banded matrices.

    M[dy, w_in*Cin + ci, w*Cout + co] = w[co, ci, dy, dx] with dx = w_in - w + 1
    (zero outside the 3-tap band), so one matmul per dy performs the full
    1-D conv along W *including* the W zero-padding of Conv2d(padding=1).
    """
    Cout, Cin = w_oihw.shape[0], w_oihw.shape[1]
    wt = jnp.transpose(w_oihw, (2, 3, 1, 0)).astype(jnp.float32)  # (dy,dx,Ci,Co)
    wi = jnp.arange(W)
    sel = (wi[None, :, None] == wi[None, None, :]
           + jnp.arange(3)[:, None, None] - 1).astype(jnp.float32)  # (dx,w_in,w)
    m = jnp.einsum("xiw,yxcf->yicwf", sel, wt)      # (dy, w_in, Cin, w, Cout)
    return m.reshape(3, W * Cin, W * Cout)


def _fold_bn(gamma, beta, mean, var, eps, W):
    """Eval-mode BN folded to lane-dense (1, W*C) scale / bias."""
    scale = (gamma / jnp.sqrt(var + eps)).astype(jnp.float32)
    bias = (beta - mean * scale).astype(jnp.float32)
    C = scale.shape[0]
    return jnp.tile(scale, W).reshape(1, W * C), jnp.tile(bias, W).reshape(1, W * C)


def _linear_interp_matrix(n_in, n_out, dtype):
    """A (n_out, n_in) s.t. A @ v == 1-D linear interp with align_corners=True."""
    if n_out == 1:
        return jnp.zeros((1, n_in), dtype).at[0, 0].set(1)
    if n_in == 1:
        return jnp.ones((n_out, 1), dtype)
    src = jnp.arange(n_out, dtype=jnp.float32) * (n_in - 1) / (n_out - 1)
    i0 = jnp.clip(jnp.floor(src), 0, n_in - 1).astype(jnp.int32)
    i1 = jnp.minimum(i0 + 1, n_in - 1)
    frac = src - i0.astype(jnp.float32)
    rows = jnp.arange(n_out)
    a = jnp.zeros((n_out, n_in), jnp.float32)
    a = a.at[rows, i0].add(1.0 - frac)
    a = a.at[rows, i1].add(frac)
    return a.astype(dtype)


# ----------------------------------------------------------------------------
# Up.forward(x1, x2)   (bilinear=True)
# ----------------------------------------------------------------------------
def up_forward(x1, x2, params, *, eps=1e-5):
    """x1: (B, C1, H1, W1) low-res feature; x2: (B, C2, Ho, Wo) skip connection."""
    B, C1, H1, W1 = x1.shape
    _, C2, Ho, Wo = x2.shape

    # nn.Upsample(scale_factor=2, bilinear, align_corners=True) -> NHWC directly
    ah = _linear_interp_matrix(H1, 2 * H1, x1.dtype)
    aw = _linear_interp_matrix(W1, 2 * W1, x1.dtype)
    x1u = jnp.einsum("Hh,bchw,Ww->bHWc", ah, x1, aw)      # (B, 2H1, 2W1, C1)

    # F.pad to the skip connection's spatial size (zero padding)
    dY, dX = Ho - x1u.shape[1], Wo - x1u.shape[2]
    if dY or dX:
        x1u = jnp.pad(x1u, ((0, 0), (dY // 2, dY - dY // 2),
                            (dX // 2, dX - dX // 2), (0, 0)))

    # Lane-dense (H, W*C) slabs for the kernel; the concat is never built.
    x1_flat = x1u.reshape(B, Ho, Wo * C1)
    x2_flat = jnp.transpose(x2, (0, 2, 3, 1)).reshape(B, Ho, Wo * C2)

    w1, bn1 = params["conv1"]
    w2, bn2 = params["conv2"]
    Cmid, Cout = w1.shape[0], w2.shape[0]

    # Split conv1's weights along Cin: first C2 channels <-> x2, rest <-> x1.
    ma = _band_weights(w1[:, :C2], Wo)                    # (3, Wo*C2,  Wo*Cmid)
    mb = _band_weights(w1[:, C2:], Wo)                    # (3, Wo*C1,  Wo*Cmid)
    mc = _band_weights(w2, Wo)                            # (3, Wo*Cmid, Wo*Cout)
    s1f, b1f = _fold_bn(*bn1, eps, Wo)
    s2f, b2f = _fold_bn(*bn2, eps, Wo)

    grid_spec = pltpu.PrefetchScalarGridSpec(
        num_scalar_prefetch=0,
        grid=(B,),
        in_specs=[
            pl.BlockSpec((None, Ho, Wo * C2), lambda b: (b, 0, 0)),
            pl.BlockSpec((None, Ho, Wo * C1), lambda b: (b, 0, 0)),
            pl.BlockSpec((3, Wo * C2, Wo * Cmid), lambda b: (0, 0, 0)),
            pl.BlockSpec((3, Wo * C1, Wo * Cmid), lambda b: (0, 0, 0)),
            pl.BlockSpec((3, Wo * Cmid, Wo * Cout), lambda b: (0, 0, 0)),
            pl.BlockSpec((1, Wo * Cmid), lambda b: (0, 0)),
            pl.BlockSpec((1, Wo * Cmid), lambda b: (0, 0)),
            pl.BlockSpec((1, Wo * Cout), lambda b: (0, 0)),
            pl.BlockSpec((1, Wo * Cout), lambda b: (0, 0)),
        ],
        out_specs=pl.BlockSpec((None, Ho, Wo * Cout), lambda b: (b, 0, 0)),
    )
    y_flat = pl.pallas_call(
        _double_conv_kernel,
        out_shape=jax.ShapeDtypeStruct((B, Ho, Wo * Cout), x2.dtype),
        grid_spec=grid_spec,
        compiler_params=pltpu.CompilerParams(
            dimension_semantics=("parallel",),            # v7x dual-TC sharding
        ),
    )(x2_flat, x1_flat, ma, mb, mc, s1f, b1f, s2f, b2f)

    # Layout plumbing back to PyTorch's NCHW.
    return jnp.transpose(y_flat.reshape(B, Ho, Wo, Cout), (0, 3, 1, 2))


# ----------------------------------------------------------------------------
# Pure-JAX reference (uses XLA conv) for correctness checking
# ----------------------------------------------------------------------------
def up_forward_reference(x1, x2, params, *, eps=1e-5):
    ah = _linear_interp_matrix(x1.shape[2], 2 * x1.shape[2], x1.dtype)
    aw = _linear_interp_matrix(x1.shape[3], 2 * x1.shape[3], x1.dtype)
    x1u = jnp.einsum("Hh,bchw,Ww->bcHW", ah, x1, aw)
    dY = x2.shape[2] - x1u.shape[2]
    dX = x2.shape[3] - x1u.shape[3]
    x1u = jnp.pad(x1u, ((0, 0), (0, 0),
                        (dY // 2, dY - dY // 2), (dX // 2, dX - dX // 2)))
    x = jnp.concatenate([x2, x1u], axis=1)

    def conv_bn_relu(x, w, gamma, beta, mean, var):
        y = jax.lax.conv_general_dilated(
            x, w, window_strides=(1, 1), padding="SAME",
            dimension_numbers=("NCHW", "OIHW", "NCHW"))
        s = gamma / jnp.sqrt(var + eps)
        y = y * s[None, :, None, None] + (beta - mean * s)[None, :, None, None]
        return jnp.maximum(y, 0.0)

    w1, bn1 = params["conv1"]
    w2, bn2 = params["conv2"]
    h = conv_bn_relu(x, w1, *bn1)
    return conv_bn_relu(h, w2, *bn2)


if __name__ == "__main__":
    # Up(in_channels=16, out_channels=8, bilinear=True):
    #   x1: (B, 8, 8, 8)  -> upsampled to (B, 8, 16, 16)
    #   x2: (B, 8, 16, 16); concat -> 16 ch; mid = 16 // 2 = 8; out = 8
    B, C1, H1, W1 = 2, 8, 8, 8
    C2, Ho, Wo = 8, 16, 16
    Cin, Cmid, Cout = C1 + C2, (C1 + C2) // 2, 8

    key = jax.random.PRNGKey(0)
    ks = jax.random.split(key, 12)
    x1 = jax.random.normal(ks[0], (B, C1, H1, W1), jnp.float32)
    x2 = jax.random.normal(ks[1], (B, C2, Ho, Wo), jnp.float32)

    w1 = jax.random.normal(ks[2], (Cmid, Cin, 3, 3), jnp.float32) * 0.2
    bn1 = (jax.random.uniform(ks[3], (Cmid,), jnp.float32, 0.5, 1.5),   # gamma
           jax.random.normal(ks[4], (Cmid,), jnp.float32) * 0.1,        # beta
           jax.random.normal(ks[5], (Cmid,), jnp.float32) * 0.1,        # running_mean
           jax.random.uniform(ks[6], (Cmid,), jnp.float32, 0.5, 1.5))   # running_var

    w2 = jax.random.normal(ks[7], (Cout, Cmid, 3, 3), jnp.float32) * 0.2
    bn2 = (jax.random.uniform(ks[8], (Cout,), jnp.float32, 0.5, 1.5),
           jax.random.normal(ks[9], (Cout,), jnp.float32) * 0.1,
           jax.random.normal(ks[10], (Cout,), jnp.float32) * 0.1,
           jax.random.uniform(ks[11], (Cout,), jnp.float32, 0.5, 1.5))

    params = {"conv1": (w1, bn1), "conv2": (w2, bn2)}

    out = up_forward(x1, x2, params)
    out = jax.block_until_ready(out)

    ref = up_forward_reference(x1, x2, params)
    assert out.shape == (B, Cout, Ho, Wo)
    assert jnp.allclose(out, ref, atol=1e-3, rtol=1e-3), (
        "mismatch vs reference, max abs err = "
        f"{float(jnp.max(jnp.abs(out - ref))):.3e}")

    print("KERNEL_OK")
</pallas_src>

<mosaic_0001>
module attributes {stable_mosaic.version = 11 : i64} {
  func.func @_double_conv_kernel(%arg0: i32, %arg1: memref<1x16x128xf32, #tpu.memory_space<vmem>>, %arg2: memref<1x16x128xf32, #tpu.memory_space<vmem>>, %arg3: memref<3x128x128xf32, #tpu.memory_space<vmem>>, %arg4: memref<3x128x128xf32, #tpu.memory_space<vmem>>, %arg5: memref<3x128x128xf32, #tpu.memory_space<vmem>>, %arg6: memref<1x128xf32, #tpu.memory_space<vmem>>, %arg7: memref<1x128xf32, #tpu.memory_space<vmem>>, %arg8: memref<1x128xf32, #tpu.memory_space<vmem>>, %arg9: memref<1x128xf32, #tpu.memory_space<vmem>>, %arg10: memref<1x16x128xf32, #tpu.memory_space<vmem>>) attributes {dimension_semantics = [#tpu.dimension_semantics<parallel>], iteration_bounds = array<i64: 2>, scalar_prefetch = 0 : i64, scratch_operands = 0 : i64, tpu.core_type = #tpu.core_type<tc>, window_params = [{transform_indices = @transform_0, window_bounds = array<i64: 1, 16, 128>}, {transform_indices = @transform_1, window_bounds = array<i64: 1, 16, 128>}, {pipeline_mode = #tpu.pipeline_mode<synchronous>, transform_indices = @transform_2, window_bounds = array<i64: 3, 128, 128>}, {pipeline_mode = #tpu.pipeline_mode<synchronous>, transform_indices = @transform_3, window_bounds = array<i64: 3, 128, 128>}, {pipeline_mode = #tpu.pipeline_mode<synchronous>, transform_indices = @transform_4, window_bounds = array<i64: 3, 128, 128>}, {pipeline_mode = #tpu.pipeline_mode<synchronous>, transform_indices = @transform_5, window_bounds = array<i64: 1, 128>}, {pipeline_mode = #tpu.pipeline_mode<synchronous>, transform_indices = @transform_6, window_bounds = array<i64: 1, 128>}, {pipeline_mode = #tpu.pipeline_mode<synchronous>, transform_indices = @transform_7, window_bounds = array<i64: 1, 128>}, {pipeline_mode = #tpu.pipeline_mode<synchronous>, transform_indices = @transform_8, window_bounds = array<i64: 1, 128>}, {transform_indices = @transform_9, window_bounds = array<i64: 1, 16, 128>}]} {
    %0 = tpu.iota {dimensions = array<i32: 0>} : vector<16x16xi32>
    %1 = tpu.iota {dimensions = array<i32: 1>} : vector<16x16xi32>
    %c1_i32 = arith.constant 1 : i32
    %2 = vector.broadcast %c1_i32 : i32 to vector<16x16xi32>
    %3 = arith.subi %0, %2 : vector<16x16xi32>
    %4 = arith.cmpi eq, %1, %3 : vector<16x16xi32>
    %cst = arith.constant 1.000000e+00 : f32
    %cst_0 = arith.constant 0.000000e+00 : f32
    %5 = vector.broadcast %cst : f32 to vector<16x16xf32>
    %6 = vector.broadcast %cst_0 : f32 to vector<16x16xf32>
    %7 = arith.select %4, %5, %6 : vector<16x16xi1>, vector<16x16xf32>
    %c1_i32_1 = arith.constant 1 : i32
    %8 = vector.broadcast %c1_i32_1 : i32 to vector<16x16xi32>
    %9 = arith.addi %0, %8 : vector<16x16xi32>
    %10 = arith.cmpi eq, %1, %9 : vector<16x16xi32>
    %cst_2 = arith.constant 1.000000e+00 : f32
    %cst_3 = arith.constant 0.000000e+00 : f32
    %11 = vector.broadcast %cst_2 : f32 to vector<16x16xf32>
    %12 = vector.broadcast %cst_3 : f32 to vector<16x16xf32>
    %13 = arith.select %10, %11, %12 : vector<16x16xi1>, vector<16x16xf32>
    %c0 = arith.constant 0 : index
    %c0_4 = arith.constant 0 : index
    %c0_5 = arith.constant 0 : index
    %14 = vector.load %arg1[%c0, %c0_4, %c0_5] : memref<1x16x128xf32, #tpu.memory_space<vmem>>, vector<1x16x128xf32>
    %15 = vector.shape_cast %14 : vector<1x16x128xf32> to vector<16x128xf32>
    %c0_6 = arith.constant 0 : index
    %c0_7 = arith.constant 0 : index
    %c0_8 = arith.constant 0 : index
    %16 = vector.load %arg2[%c0_6, %c0_7, %c0_8] : memref<1x16x128xf32, #tpu.memory_space<vmem>>, vector<1x16x128xf32>
    %17 = vector.shape_cast %16 : vector<1x16x128xf32> to vector<16x128xf32>
    %c0_9 = arith.constant 0 : index
    %c0_10 = arith.constant 0 : index
    %c0_11 = arith.constant 0 : index
    %18 = vector.load %arg3[%c0_9, %c0_10, %c0_11] : memref<3x128x128xf32, #tpu.memory_space<vmem>>, vector<1x128x128xf32>
    %19 = vector.shape_cast %18 : vector<1x128x128xf32> to vector<128x128xf32>
    %cst_12 = arith.constant dense<0.000000e+00> : vector<16x128xf32>
    %20 = tpu.matmul %15, %19, %cst_12 {dimension_numbers = #tpu.dot_dimension_numbers<[1], [0], [0], [1], [0, 0, 1, 1], [], []>} : vector<16x128xf32>, vector<128x128xf32>, vector<16x128xf32> -> vector<16x128xf32>
    %c0_13 = arith.constant 0 : index
    %c0_14 = arith.constant 0 : index
    %c0_15 = arith.constant 0 : index
    %21 = vector.load %arg4[%c0_13, %c0_14, %c0_15] : memref<3x128x128xf32, #tpu.memory_space<vmem>>, vector<1x128x128xf32>
    %22 = vector.shape_cast %21 : vector<1x128x128xf32> to vector<128x128xf32>
    %cst_16 = arith.constant dense<0.000000e+00> : vector<16x128xf32>
    %23 = tpu.matmul %17, %22, %cst_16 {dimension_numbers = #tpu.dot_dimension_numbers<[1], [0], [0], [1], [0, 0, 1, 1], [], []>} : vector<16x128xf32>, vector<128x128xf32>, vector<16x128xf32> -> vector<16x128xf32>
    %24 = arith.addf %20, %23 : vector<16x128xf32>
    %c1 = arith.constant 1 : index
    %c0_17 = arith.constant 0 : index
    %c0_18 = arith.constant 0 : index
    %25 = vector.load %arg3[%c1, %c0_17, %c0_18] : memref<3x128x128xf32, #tpu.memory_space<vmem>>, vector<1x128x128xf32>
    %26 = vector.shape_cast %25 : vector<1x128x128xf32> to vector<128x128xf32>
    %cst_19 = arith.constant dense<0.000000e+00> : vector<16x128xf32>
    %27 = tpu.matmul %15, %26, %cst_19 {dimension_numbers = #tpu.dot_dimension_numbers<[1], [0], [0], [1], [0, 0, 1, 1], [], []>} : vector<16x128xf32>, vector<128x128xf32>, vector<16x128xf32> -> vector<16x128xf32>
    %c1_20 = arith.constant 1 : index
    %c0_21 = arith.constant 0 : index
    %c0_22 = arith.constant 0 : index
    %28 = vector.load %arg4[%c1_20, %c0_21, %c0_22] : memref<3x128x128xf32, #tpu.memory_space<vmem>>, vector<1x128x128xf32>
    %29 = vector.shape_cast %28 : vector<1x128x128xf32> to vector<128x128xf32>
    %cst_23 = arith.constant dense<0.000000e+00> : vector<16x128xf32>
    %30 = tpu.matmul %17, %29, %cst_23 {dimension_numbers = #tpu.dot_dimension_numbers<[1], [0], [0], [1], [0, 0, 1, 1], [], []>} : vector<16x128xf32>, vector<128x128xf32>, vector<16x128xf32> -> vector<16x128xf32>
    %31 = arith.addf %27, %30 : vector<16x128xf32>
    %c2 = arith.constant 2 : index
    %c0_24 = arith.constant 0 : index
    %c0_25 = arith.constant 0 : index
    %32 = vector.load %arg3[%c2, %c0_24, %c0_25] : memref<3x128x128xf32, #tpu.memory_space<vmem>>, vector<1x128x128xf32>
    %33 = vector.shape_cast %32 : vector<1x128x128xf32> to vector<128x128xf32>
    %cst_26 = arith.constant dense<0.000000e+00> : vector<16x128xf32>
    %34 = tpu.matmul %15, %33, %cst_26 {dimension_numbers = #tpu.dot_dimension_numbers<[1], [0], [0], [1], [0, 0, 1, 1], [], []>} : vector<16x128xf32>, vector<128x128xf32>, vector<16x128xf32> -> vector<16x128xf32>
    %c2_27 = arith.constant 2 : index
    %c0_28 = arith.constant 0 : index
    %c0_29 = arith.constant 0 : index
    %35 = vector.load %arg4[%c2_27, %c0_28, %c0_29] : memref<3x128x128xf32, #tpu.memory_space<vmem>>, vector<1x128x128xf32>
    %36 = vector.shape_cast %35 : vector<1x128x128xf32> to vector<128x128xf32>
    %cst_30 = arith.constant dense<0.000000e+00> : vector<16x128xf32>
    %37 = tpu.matmul %17, %36, %cst_30 {dimension_numbers = #tpu.dot_dimension_numbers<[1], [0], [0], [1], [0, 0, 1, 1], [], []>} : vector<16x128xf32>, vector<128x128xf32>, vector<16x128xf32> -> vector<16x128xf32>
    %38 = arith.addf %34, %37 : vector<16x128xf32>
    %cst_31 = arith.constant dense<0.000000e+00> : vector<16x128xf32>
    %39 = tpu.matmul %7, %24, %cst_31 {dimension_numbers = #tpu.dot_dimension_numbers<[1], [0], [0], [1], [0, 0, 1, 1], [], []>} : vector<16x16xf32>, vector<16x128xf32>, vector<16x128xf32> -> vector<16x128xf32>
    %40 = arith.addf %31, %39 : vector<16x128xf32>
    %cst_32 = arith.constant dense<0.000000e+00> : vector<16x128xf32>
    %41 = tpu.matmul %13, %38, %cst_32 {dimension_numbers = #tpu.dot_dimension_numbers<[1], [0], [0], [1], [0, 0, 1, 1], [], []>} : vector<16x16xf32>, vector<16x128xf32>, vector<16x128xf32> -> vector<16x128xf32>
    %42 = arith.addf %40, %41 : vector<16x128xf32>
    %c0_33 = arith.constant 0 : index
    %c0_34 = arith.constant 0 : index
    %43 = vector.load %arg6[%c0_33, %c0_34] : memref<1x128xf32, #tpu.memory_space<vmem>>, vector<1x128xf32>
    %44 = vector.broadcast %43 : vector<1x128xf32> to vector<16x128xf32>
    %45 = arith.mulf %42, %44 : vector<16x128xf32>
    %c0_35 = arith.constant 0 : index
    %c0_36 = arith.constant 0 : index
    %46 = vector.load %arg7[%c0_35, %c0_36] : memref<1x128xf32, #tpu.memory_space<vmem>>, vector<1x128xf32>
    %47 = vector.broadcast %46 : vector<1x128xf32> to vector<16x128xf32>
    %48 = arith.addf %45, %47 : vector<16x128xf32>
    %cst_37 = arith.constant 0.000000e+00 : f32
    %49 = vector.broadcast %cst_37 : f32 to vector<16x128xf32>
    %50 = arith.maximumf %48, %49 : vector<16x128xf32>
    %c0_38 = arith.constant 0 : index
    %c0_39 = arith.constant 0 : index
    %c0_40 = arith.constant 0 : index
    %51 = vector.load %arg5[%c0_38, %c0_39, %c0_40] : memref<3x128x128xf32, #tpu.memory_space<vmem>>, vector<1x128x128xf32>
    %52 = vector.shape_cast %51 : vector<1x128x128xf32> to vector<128x128xf32>
    %cst_41 = arith.constant dense<0.000000e+00> : vector<16x128xf32>
    %53 = tpu.matmul %50, %52, %cst_41 {dimension_numbers = #tpu.dot_dimension_numbers<[1], [0], [0], [1], [0, 0, 1, 1], [], []>} : vector<16x128xf32>, vector<128x128xf32>, vector<16x128xf32> -> vector<16x128xf32>
    %c1_42 = arith.constant 1 : index
    %c0_43 = arith.constant 0 : index
    %c0_44 = arith.constant 0 : index
    %54 = vector.load %arg5[%c1_42, %c0_43, %c0_44] : memref<3x128x128xf32, #tpu.memory_space<vmem>>, vector<1x128x128xf32>
    %55 = vector.shape_cast %54 : vector<1x128x128xf32> to vector<128x128xf32>
    %cst_45 = arith.constant dense<0.000000e+00> : vector<16x128xf32>
    %56 = tpu.matmul %50, %55, %cst_45 {dimension_numbers = #tpu.dot_dimension_numbers<[1], [0], [0], [1], [0, 0, 1, 1], [], []>} : vector<16x128xf32>, vector<128x128xf32>, vector<16x128xf32> -> vector<16x128xf32>
    %c2_46 = arith.constant 2 : index
    %c0_47 = arith.constant 0 : index
    %c0_48 = arith.constant 0 : index
    %57 = vector.load %arg5[%c2_46, %c0_47, %c0_48] : memref<3x128x128xf32, #tpu.memory_space<vmem>>, vector<1x128x128xf32>
    %58 = vector.shape_cast %57 : vector<1x128x128xf32> to vector<128x128xf32>
    %cst_49 = arith.constant dense<0.000000e+00> : vector<16x128xf32>
    %59 = tpu.matmul %50, %58, %cst_49 {dimension_numbers = #tpu.dot_dimension_numbers<[1], [0], [0], [1], [0, 0, 1, 1], [], []>} : vector<16x128xf32>, vector<128x128xf32>, vector<16x128xf32> -> vector<16x128xf32>
    %cst_50 = arith.constant dense<0.000000e+00> : vector<16x128xf32>
    %60 = tpu.matmul %7, %53, %cst_50 {dimension_numbers = #tpu.dot_dimension_numbers<[1], [0], [0], [1], [0, 0, 1, 1], [], []>} : vector<16x16xf32>, vector<16x128xf32>, vector<16x128xf32> -> vector<16x128xf32>
    %61 = arith.addf %56, %60 : vector<16x128xf32>
    %cst_51 = arith.constant dense<0.000000e+00> : vector<16x128xf32>
    %62 = tpu.matmul %13, %59, %cst_51 {dimension_numbers = #tpu.dot_dimension_numbers<[1], [0], [0], [1], [0, 0, 1, 1], [], []>} : vector<16x16xf32>, vector<16x128xf32>, vector<16x128xf32> -> vector<16x128xf32>
    %63 = arith.addf %61, %62 : vector<16x128xf32>
    %c0_52 = arith.constant 0 : index
    %c0_53 = arith.constant 0 : index
    %64 = vector.load %arg8[%c0_52, %c0_53] : memref<1x128xf32, #tpu.memory_space<vmem>>, vector<1x128xf32>
    %65 = vector.broadcast %64 : vector<1x128xf32> to vector<16x128xf32>
    %66 = arith.mulf %63, %65 : vector<16x128xf32>
    %c0_54 = arith.constant 0 : index
    %c0_55 = arith.constant 0 : index
    %67 = vector.load %arg9[%c0_54, %c0_55] : memref<1x128xf32, #tpu.memory_space<vmem>>, vector<1x128xf32>
    %68 = vector.broadcast %67 : vector<1x128xf32> to vector<16x128xf32>
    %69 = arith.addf %66, %68 : vector<16x128xf32>
    %cst_56 = arith.constant 0.000000e+00 : f32
    %70 = vector.broadcast %cst_56 : f32 to vector<16x128xf32>
    %71 = arith.maximumf %69, %70 : vector<16x128xf32>
    %c0_57 = arith.constant 0 : index
    %c0_58 = arith.constant 0 : index
    %c0_59 = arith.constant 0 : index
    %72 = vector.load %arg10[%c0_57, %c0_58, %c0_59] : memref<1x16x128xf32, #tpu.memory_space<vmem>>, vector<1x16x128xf32>
    %73 = vector.shape_cast %72 : vector<1x16x128xf32> to vector<16x128xf32>
    %74 = vector.shape_cast %71 : vector<16x128xf32> to vector<1x16x128xf32>
    tpu.vector_store %arg10[%c0_57, %c0_58, %c0_59], %74 {strides = array<i32>} : memref<1x16x128xf32, #tpu.memory_space<vmem>>, vector<1x16x128xf32>,
    return
  }
  func.func @transform_0(%arg0: i32) -> (i32, i32, i32) {
    %c0_i32 = arith.constant 0 : i32
    %c0_i32_0 = arith.constant 0 : i32
    %c0_i32_1 = arith.constant 0 : i32
    return %arg0, %c0_i32, %c0_i32_0 : i32, i32, i32
  }
  func.func @transform_1(%arg0: i32) -> (i32, i32, i32) {
    %c0_i32 = arith.constant 0 : i32
    %c0_i32_0 = arith.constant 0 : i32
    %c0_i32_1 = arith.constant 0 : i32
    return %arg0, %c0_i32, %c0_i32_0 : i32, i32, i32
  }
  func.func @transform_2(%arg0: i32) -> (i32, i32, i32) {
    %c0_i32 = arith.constant 0 : i32
    %c0_i32_0 = arith.constant 0 : i32
    %c0_i32_1 = arith.constant 0 : i32
    %c0_i32_2 = arith.constant 0 : i32
    return %c0_i32, %c0_i32_0, %c0_i32_1 : i32, i32, i32
  }
  func.func @transform_3(%arg0: i32) -> (i32, i32, i32) {
    %c0_i32 = arith.constant 0 : i32
    %c0_i32_0 = arith.constant 0 : i32
    %c0_i32_1 = arith.constant 0 : i32
    %c0_i32_2 = arith.constant 0 : i32
    return %c0_i32, %c0_i32_0, %c0_i32_1 : i32, i32, i32
  }
  func.func @transform_4(%arg0: i32) -> (i32, i32, i32) {
    %c0_i32 = arith.constant 0 : i32
    %c0_i32_0 = arith.constant 0 : i32
    %c0_i32_1 = arith.constant 0 : i32
    %c0_i32_2 = arith.constant 0 : i32
    return %c0_i32, %c0_i32_0, %c0_i32_1 : i32, i32, i32
  }
  func.func @transform_5(%arg0: i32) -> (i32, i32) {
    %c0_i32 = arith.constant 0 : i32
    %c0_i32_0 = arith.constant 0 : i32
    %c0_i32_1 = arith.constant 0 : i32
    return %c0_i32, %c0_i32_0 : i32, i32
  }
  func.func @transform_6(%arg0: i32) -> (i32, i32) {
    %c0_i32 = arith.constant 0 : i32
    %c0_i32_0 = arith.constant 0 : i32
    %c0_i32_1 = arith.constant 0 : i32
    return %c0_i32, %c0_i32_0 : i32, i32
  }
  func.func @transform_7(%arg0: i32) -> (i32, i32) {
    %c0_i32 = arith.constant 0 : i32
    %c0_i32_0 = arith.constant 0 : i32
    %c0_i32_1 = arith.constant 0 : i32
    return %c0_i32, %c0_i32_0 : i32, i32
  }
  func.func @transform_8(%arg0: i32) -> (i32, i32) {
    %c0_i32 = arith.constant 0 : i32
    %c0_i32_0 = arith.constant 0 : i32
    %c0_i32_1 = arith.constant 0 : i32
    return %c0_i32, %c0_i32_0 : i32, i32
  }
  func.func @transform_9(%arg0: i32) -> (i32, i32, i32) {
    %c0_i32 = arith.constant 0 : i32
    %c0_i32_0 = arith.constant 0 : i32
    %c0_i32_1 = arith.constant 0 : i32
    return %arg0, %c0_i32, %c0_i32_0 : i32, i32, i32
  }
}

</mosaic_0001>

<bundles_post_ra>
// kernel: tpu_custom_call.1
= control target key start
LH: loop header
LB: loop body
LE: loop exit
PB: predicated region body
PF: predicated region fallthrough
CT: control target
= control target key end

     0   :  { %s3417_s0 = inlined_call_operand.hbm [shape: f32[2,16,128], index: 0, kind: input, shape index: {}]   ;;  %s3418_s1 = inlined_call_operand.hbm [shape: f32[2,16,128], index: 1, kind: input, shape index: {}]   ;;  %s3419_s2 = inlined_call_operand.hbm [shape: f32[3,128,128], index: 2, kind: input, shape index: {}]   ;;  %s3420_s3 = inlined_call_operand.hbm [shape: f32[3,128,128], index: 3, kind: input, shape index: {}]   ;;  %s3421_s4 = inlined_call_operand.hbm [shape: f32[3,128,128], index: 4, kind: input, shape index: {}]   ;;  %s3422_s5 = inlined_call_operand.vmem [shape: f32[1,128], index: 5, kind: input, shape index: {}]   ;;  %s3423_s6 = inlined_call_operand.vmem [shape: f32[1,128], index: 6, kind: input, shape index: {}]   ;;  %s3424_s7 = inlined_call_operand.vmem [shape: f32[1,128], index: 7, kind: input, shape index: {}]   ;;  %s3425_s8 = inlined_call_operand.vmem [shape: f32[1,128], index: 8, kind: input, shape index: {}]   ;;  %s3426_s9 = inlined_call_operand.hbm [shape: f32[2,16,128], index: 9, kind: output, shape index: {}]  }
   0x1   :  { %3437 = sst [smem:[#allocation20_spill]] %s3417_s0 }
   0x2   :  { %3438 = sst [smem:[#allocation21_spill]] %s3419_s2 }
   0x3   :  { %3439 = sst [smem:[#allocation22_spill]] %s3420_s3 }
   0x4   :  { %3440 = sst [smem:[#allocation23_spill]] %s3421_s4 }
   0x5   :  { %3441 = sst [smem:[#allocation24_spill]] %s3426_s9 }
   0x6   :  { %14 = vsyncpa [#allocation3], 0 }
   0x7   :  { %16 = vsyncpa [#allocation3 + $0x1], 0 }
   0x8   :  { %17 = vsyncpa [#allocation6], 0 }
   0x9   :  { %19 = vsyncpa [#allocation6 + $0x1], 0 }
   0xa   :  { %20 = vsyncpa [#allocation9], 0 }
   0xb   :  { %21 = vsyncpa [#allocation4], 0 }
   0xc   :  { %23 = vsyncpa [#allocation4 + $0x1], 0  ;;  %s3031_s30 = smov 0   ;;  %s3033_s10 = smov 0  }
   0xd   :  { %s3035_s11 = smov 0   ;;  %s3037_s12 = smov 0  }
   0xe LB: > { %3442 = sst [smem:[#allocation17_spill]] %s2956_s30  ;;  %s3052_s13 = sadd.s32 4294967295, %s2968_s12   ;;  %s2968_s12 = sphi %s3037_s12, %s3474_s12   ;;  %s2964_s11 = sphi %s3035_s11, %s3473_s11   ;;  %s2960_s10 = sphi %s3033_s10, %s3472_s10   ;;  %s2956_s30 = sphi %s3031_s30, %s3471_s30  }
   0xf   : > { %s1779_s14 = sadd.s32 4294967294, %s2968_s12   ;;  %p49_p0 = scmp.ne.s32.totalorder %s2960_s10, %s2956_s30 }
  0x10   : > { %p3427_p1 = scmp.eq.s32.totalorder %s3052_s13, 0  ;;  %p252_p3 = scmp.eq.s32.totalorder %s1779_s14, 1 }
  0x11   : > { %p1780_p5 = scmp.ge.s32.totalorder %s2968_s12, 1  ;;  %p259_p7 = scmp.lt.s32.totalorder %s2968_s12, 3 }
  0x12   : > { %p3061_p4 = por %p3427_p1, %p49_p0  ;;  %p3066_p6 = por %p252_p3, %p49_p0 }
  0x13   : > { %p3071_p8 = pnand %p1780_p5, %p259_p7  ;;  %s2970_s18 = smov [#allocation7]  }
  0x14   : > { %s3443_s15 = scalar_select %p3061_p4, 1, 0 }
  0x15   : > { %s3444_s16 = scalar_select %p3066_p6, 1, 0 }
  0x16   : > { %s3446_s17 = scalar_select %p3071_p8, 1, 0 }
  0x17   : > { %3445 = sst [smem:[#allocation18_spill]] %s3444_s16  ;;  %s271_s19 = sshll.u32 %s2970_s18, 4  ;;  %s3075_s19 = int_to_ptr.vmem [resolvable:$true] %s271_s19 }
  0x18   : > { %p2677_p9 = pneg %p3071_p8  ;;  %s2971_s21 = smov [#allocation8]  }
  0x19   : > { %s284_s22 = sshll.u32 %s2971_s21, 4  ;;  %s2972_s23 = smov [#allocation10]   ;;  %s3086_s22 = int_to_ptr.vmem [resolvable:$true] %s284_s22 }
  0x1a   : > { %p3082_p11 = pnand %p2677_p9, %p3427_p1  ;;  %s3088_s24 = sshll.u32 %s2972_s23, 4  ;;  %s298_s24 = int_to_ptr.vmem [resolvable:$true] %s3088_s24 }
  0x1b   : > { %s3448_s2 = sld [smem:[#allocation21_spill]] }
  0x1c   : > { %p3098_p13 = pneg %p3082_p11 }
  0x21   : > { %s2746_s27 = scalar_lea.hbm %s3448_s2, 6144 }
  0x22   : > { %p2747_p12 = scmp.ne.s32.totalorder %s3448_s2, %s2746_s27  ;;  %p2753_p5 = scmp.lt.u32.totalorder %s2746_s27, %s3448_s2 }
  0x24   : > { %p2749_p0 = pnand %p3098_p13, %p2747_p12 }
  0x26   : > { %p2750_p3 = pneg %p2749_p0 }
  0x28   : > { %p2755_p7 = pnand %p2753_p5, %p2750_p3 }
  0x2a   : > { %2758 = shalt.err (!%p2755_p7)
}
  0x2b   : > { %s2759_s23 = scalar_lea.vmem %s3075_s19, 6144  ;;  %p2767_p2 = scmp.lt.s32.totalorder %s3075_s19, %s3075_s19 }
  0x2c   : > { %p2760_p9 = scmp.ne.s32.totalorder %s3075_s19, %s2759_s23  ;;  %p2768_p6 = scmp.lt.s32.totalorder %s2759_s23, %s2759_s23 }
  0x2e   : > { %p2762_p10 = pnand %p2760_p9, %p3098_p13  ;;  %p2769_p12 = por %p2768_p6, %p2767_p2 }
  0x30   : > { %p2763_p1 = pneg %p2762_p10 }
  0x32   : > { %p2770_p0 = pnand %p2769_p12, %p2763_p1 }
  0x34   : > { %2773 = shalt.err (!%p2770_p0)
}
  0x35   : > { %s3433_s25 = smov 128   ;;  %s3435_s26 = smov 8  }
  0x36   : > { %2680 = dma.hbm_to_vmem [thread:$0]  (!%p3082_p11), %s3448_s2, 6144, %s3075_s19, [#allocation6], %s3433_s25, %s3433_s25, %s3435_s26  }
  0x37   : > { %s3450_s3 = sld [smem:[#allocation22_spill]] }
  0x3d   : > { %s2774_s21 = scalar_lea.hbm %s3450_s3, 6144 }
  0x3e   : > { %p2775_p1 = scmp.ne.s32.totalorder %s3450_s3, %s2774_s21  ;;  %p2781_p10 = scmp.lt.u32.totalorder %s2774_s21, %s3450_s3 }
  0x40   : > { %p2777_p2 = pnand %p2775_p1, %p3098_p13 }
  0x42   : > { %p2778_p6 = pneg %p2777_p2 }
  0x44   : > { %p2783_p3 = pnand %p2781_p10, %p2778_p6 }
  0x46   : > { %2786 = shalt.err (!%p2783_p3)
}
  0x47   : > { %s2787_s19 = scalar_lea.vmem %s3086_s22, 6144  ;;  %p2795_p12 = scmp.lt.s32.totalorder %s3086_s22, %s3086_s22 }
  0x48   : > { %p2788_p5 = scmp.ne.s32.totalorder %s3086_s22, %s2787_s19  ;;  %p2796_p0 = scmp.lt.s32.totalorder %s2787_s19, %s2787_s19 }
  0x4a   : > { %p2790_p7 = pnand %p2788_p5, %p3098_p13  ;;  %p2797_p1 = por %p2796_p0, %p2795_p12 }
  0x4c   : > { %p2791_p9 = pneg %p2790_p7 }
  0x4e   : > { %p2798_p2 = pnand %p2797_p1, %p2791_p9 }
  0x50   : > { %2801 = shalt.err (!%p2798_p2)
}
  0x51   : > { %2683 = dma.hbm_to_vmem [thread:$0]  (!%p3082_p11), %s3450_s3, 6144, %s3086_s22, [#allocation9], %s3433_s25, %s3433_s25, %s3435_s26  }
  0x52   : > { %s3451_s4 = sld [smem:[#allocation23_spill]] }
  0x58   : > { %s2802_s28 = scalar_lea.hbm %s3451_s4, 6144 }
  0x59   : > { %p2803_p6 = scmp.ne.s32.totalorder %s3451_s4, %s2802_s28  ;;  %p2809_p5 = scmp.lt.u32.totalorder %s2802_s28, %s3451_s4 }
  0x5b   : > { %p2805_p10 = pnand %p2803_p6, %p3098_p13 }
  0x5d   : > { %p2806_p3 = pneg %p2805_p10 }
  0x5f   : > { %p2811_p7 = pnand %p2809_p5, %p2806_p3 }
  0x61   : > { %2814 = shalt.err (!%p2811_p7)
}
  0x62   : > { %s2815_s19 = scalar_lea.vmem %s298_s24, 6144  ;;  %p2823_p1 = scmp.lt.s32.totalorder %s298_s24, %s298_s24 }
  0x63   : > { %p2816_p9 = scmp.ne.s32.totalorder %s298_s24, %s2815_s19  ;;  %p2824_p2 = scmp.lt.s32.totalorder %s2815_s19, %s2815_s19 }
  0x65   : > { %p2818_p12 = pnand %p2816_p9, %p3098_p13  ;;  %p2825_p4 = por %p2824_p2, %p2823_p1 }
  0x67   : > { %p2819_p0 = pneg %p2818_p12 }
  0x69   : > { %p2826_p8 = pnand %p2825_p4, %p2819_p0 }
  0x6b   : > { %2829 = shalt.err (!%p2826_p8)
}
  0x6c   : > { %2686 = dma.hbm_to_vmem [thread:$0]  (!%p3082_p11), %s3451_s4, 6144, %s298_s24, [#allocation9], %s3433_s25, %s3433_s25, %s3435_s26  }
  0x6d   : > { %s3171_s14 = sadd.s32 1, %s2968_s12   ;;  %s36_s30 = sadd.s32 1, %s2964_s11 }
  0x6e   : > { %s33_s20 = ssub.s32 %s2968_s12, %s3171_s14  ;;  %p43_p8 = scmp.ne.s32.totalorder %s2964_s11, %s2960_s10 }
  0x6f   : > { %p34_p4 = scmp.eq.s32.totalorder %s33_s20, 0  ;;  %p44_p13 = scmp.eq.s32.totalorder %s2968_s12, 0 }
  0x70   : > { %p2701_p6 = scmp.lt.s32.totalorder %s2968_s12, 2  ;;  %p3453_p3 = scmp.eq.s32.totalorder %s3052_s13, 1 }
  0x71   : > { %s3181_s16 = scalar_select %p34_p4, %s2964_s11, %s36_s30  }
  0x72   : > { %p45_p10 = por %p44_p13, %p43_p8  ;;  %p3185_p5 = por %p3453_p3, %p43_p8 }
  0x73   : > { %3452 = sst [smem:[#allocation19_spill]] %s3181_s16  ;;  %s323_s28 = sand.u32 1, %s2964_s11  }
  0x74   : > { %s1817_s29 = sshll.u32 %s2968_s12, 8  ;;  %s3191_s24 = sshll.u32 %s323_s28, 4 }
  0x75   : > { %s3455_s0 = sld [smem:[#allocation20_spill]]  ;;  %s327_s19 = scalar_lea.vmem [#allocation2], %s3191_s24 }
  0x76   : > { %s334_s22 = sshll.u32 %s327_s19, 4  ;;  %p3199_p11 = pnand %p2701_p6, %p45_p10  ;;  %s3203_s22 = int_to_ptr.vmem [resolvable:$true] %s334_s22 }
  0x77   : > { %s3208_s18 = scalar_lea.hbm %s3418_s1, %s1817_s29  ;;  %s3210_s21 = scalar_lea.sflag [#allocation3], %s323_s28 }
  0x78   : > { %p2832_p9 = pneg %p3199_p11 }
  0x7b   : > { %s3196_s23 = scalar_lea.hbm %s3455_s0, %s1817_s29  ;;  %s2835_s2 = scalar_lea.hbm %s3455_s0, 512 }
  0x7c   : > { %s2830_s25 = scalar_lea.hbm %s3196_s23, 256  ;;  %p2836_p1 = scmp.lt.u32.totalorder %s3196_s23, %s3455_s0 }
  0x7d   : > { %p2831_p7 = scmp.ne.s32.totalorder %s3196_s23, %s2830_s25  ;;  %p2837_p2 = scmp.lt.u32.totalorder %s2835_s2, %s2830_s25 }
  0x7e   : > { %p2839_p8 = scmp.lt.u32.totalorder %s2830_s25, %s3196_s23 }
  0x7f   : > { %p2833_p12 = pnand %p2832_p9, %p2831_p7  ;;  %p2838_p4 = por %p2837_p2, %p2836_p1 }
  0x81   : > { %p2834_p0 = pneg %p2833_p12  ;;  %p2840_p13 = por %p2839_p8, %p2838_p4 }
  0x83   : > { %p2841_p6 = pnand %p2840_p13, %p2834_p0 }
  0x85   : > { %2844 = shalt.err (!%p2841_p6)
}
  0x86   : > { %s2845_s28 = scalar_lea.vmem %s3203_s22, 256  ;;  %s2975_s26 = smov [#allocation2]  }
  0x87   : > { %p2846_p10 = scmp.ne.s32.totalorder %s3203_s22, %s2845_s28  ;;  %s2850_s29 = sshll.u32 %s2975_s26, 4  ;;  %s2851_s29 = int_to_ptr.vmem [resolvable:$false] %s2850_s29 }
  0x88   : > { %s2852_s3 = scalar_lea.vmem %s2851_s29, 512  ;;  %p2853_p12 = scmp.lt.s32.totalorder %s3203_s22, %s2851_s29 }
  0x89   : > { %p2848_p3 = pnand %p2846_p10, %p2832_p9  ;;  %p2854_p1 = scmp.lt.s32.totalorder %s2852_s3, %s2845_s28 }
  0x8b   : > { %p2849_p7 = pneg %p2848_p3  ;;  %p2855_p2 = por %p2854_p1, %p2853_p12 }
  0x8d   : > { %p2856_p4 = pnand %p2855_p2, %p2849_p7 }
  0x8f   : > { %2859 = shalt.err (!%p2856_p4)
}
  0x90   : > { %s3457_s2 = smov 8   ;;  %s3458_s4 = smov 128  }
  0x91   : > { %2690 = dma.hbm_to_vmem [thread:$0]  (!%p3199_p11), %s3196_s23, 256, %s3203_s22, %s3210_s21, %s3458_s4, %s3458_s4, %s3457_s2  }
  0x92   : > { %s348_s25 = scalar_lea.vmem [#allocation5], %s3191_s24  ;;  %s344_s30 = sand.u32 1, %s2968_s12  }
  0x93   : > { %s355_s20 = sshll.u32 %s348_s25, 4  ;;  %s3245_s19 = scalar_lea.sflag [#allocation6], %s344_s30  ;;  %s3243_s20 = int_to_ptr.vmem [resolvable:$true] %s355_s20 }
  0x94   : > { %s2860_s28 = scalar_lea.hbm %s3208_s18, 256  ;;  %s2865_s3 = scalar_lea.hbm %s3418_s1, 512 }
  0x95   : > { %p2861_p0 = scmp.ne.s32.totalorder %s3208_s18, %s2860_s28  ;;  %p2866_p6 = scmp.lt.u32.totalorder %s3208_s18, %s3418_s1 }
  0x96   : > { %p2867_p10 = scmp.lt.u32.totalorder %s2865_s3, %s2860_s28  ;;  %p2869_p7 = scmp.lt.u32.totalorder %s2860_s28, %s3208_s18 }
  0x97   : > { %p2863_p8 = pnand %p2861_p0, %p2832_p9 }
  0x98   : > { %p2868_p3 = por %p2867_p10, %p2866_p6 }
  0x99   : > { %p2864_p13 = pneg %p2863_p8 }
  0x9a   : > { %p2870_p12 = por %p2869_p7, %p2868_p3 }
  0x9c   : > { %p2871_p1 = pnand %p2870_p12, %p2864_p13 }
  0x9e   : > { %2874 = shalt.err (!%p2871_p1)
}
  0x9f   : > { %s2875_s24 = scalar_lea.vmem %s3243_s20, 256  ;;  %s2976_s23 = smov [#allocation5]  }
  0xa0   : > { %p2876_p2 = scmp.ne.s32.totalorder %s3243_s20, %s2875_s24  ;;  %s2880_s22 = sshll.u32 %s2976_s23, 4  ;;  %s2881_s22 = int_to_ptr.vmem [resolvable:$false] %s2880_s22 }
  0xa1   : > { %s2882_s0 = scalar_lea.vmem %s2881_s22, 512  ;;  %p2883_p8 = scmp.lt.s32.totalorder %s3243_s20, %s2881_s22 }
  0xa2   : > { %p2878_p4 = pnand %p2876_p2, %p2832_p9  ;;  %p2884_p6 = scmp.lt.s32.totalorder %s2882_s0, %s2875_s24 }
  0xa4   : > { %p2879_p0 = pneg %p2878_p4  ;;  %p2885_p10 = por %p2884_p6, %p2883_p8 }
  0xa6   : > { %p2886_p3 = pnand %p2885_p10, %p2879_p0 }
  0xa8   : > { %2889 = shalt.err (!%p2886_p3)
}
  0xa9   : > { %2693 = dma.hbm_to_vmem [thread:$0]  (!%p3199_p11), %s3208_s18, 256, %s3243_s20, %s3245_s19, %s3458_s4, %s3458_s4, %s3457_s2  }
  0xaa   : > { %p3459_p9 = scmp.ne.s32.totalorder %s3446_s17, 0 }
  0xab   : > { %s3277_s16 = sand.u32 (!%p3459_p9), 1, %s2960_s10   ;;  %p3460_p13 = scmp.ne.s32.totalorder (!%p3459_p9), %s3443_s15, 0 }
  0xac   : > { %367 = sbr.rel (%p3459_p9) target bundleno = 1247 (0x4df), region = 56  ;;  %s3280_s21 = sshll.u32 (!%p3459_p9), %s3277_s16, 4 }
  0xad   : > { %s370_s9 = scalar_lea.sflag (!%p3459_p9), [#allocation3], %s3277_s16  ;;  %s373_s25 = scalar_lea.vmem (!%p3459_p9), [#allocation2], %s3280_s21 }
  0xb3   : > { %2935 = dma.done.wait (%p3460_p13), %s370_s9, 256  }
  0xb4   : > { %2937 = vsyncadd (%p3460_p13), %s370_s9, 4294967040  ;;  %s378_s17 = sand.u32 1, %s3052_s13   ;;  %s382_s2 = scalar_lea.vmem [#allocation5], %s3280_s21 }
  0xb5   : > { %s379_s18 = scalar_lea.sflag [#allocation6], %s378_s17 }
  0xb6   : > { %2939 = dma.done.wait (%p3460_p13), %s379_s18, 256  }
  0xb7   : > { %2941 = vsyncadd (%p3460_p13), %s379_s18, 4294967040  ;;  %p3461_p11 = scmp.eq.s32.totalorder %s3052_s13, 0 }
  0xb9   : > { %2943 = dma.done.wait (%p3461_p11), [#allocation6], 6144   ;;  %p3462_p7 = pmov %p3461_p11 }
  0xbb   : > { %2945 = vsyncadd (%p3462_p7), [#allocation6], 4294961152  ;;  %p3463_p12 = pmov %p3462_p7 }
  0xbc   : > { %p3464_p1 = pmov %p3462_p7 }
  0xbd   : > { %2947 = dma.done.wait (%p3463_p12), [#allocation9], 12288  }
  0xbe   : > { %2949 = vsyncadd (%p3464_p1), [#allocation9], 4294955008  ;;  %v471_v0 = vld [vmem:[#allocation8] sm:$0xff]  ;;  %v472_v1 = vld [vmem:[#allocation8 + $0x8] sm:$0xff]  ;;  %vm1005_vm0 = vcmask 130048   ;;  %s433_s3 = scalar_lea.vmem [#allocation11], %s3280_s21 }
  0xbf   : > { %v473_v2 = vld [vmem:[#allocation8 + $0x10] sm:$0xff]  ;;  %v2341_v3 = vpack.c.bf16 %v472_v1, %v471_v0  ;;  %v474_v4 = vld [vmem:[#allocation8 + $0x18] sm:$0xff]  ;;  %v475_v6 = vld [vmem:[#allocation8 + $0x20] sm:$0xff]  ;;  %s1655_s24 = sshll.u32 %s433_s3, 4  ;;  %s1819_s23 = sshll.u32 %s3052_s13, 8  ;;  %s3368_s24 = int_to_ptr.vmem [resolvable:$true] %s1655_s24 }
  0xc0   : > { %v2345_v5 = vpack.c.bf16 %v474_v4, %v473_v2  ;;  %v476_v7 = vld [vmem:[#allocation8 + $0x28] sm:$0xff]  ;;  %v3304_v9 = vld [vmem:[%s382_s2] sm:$0xff]  ;;  %v478_v11 = vld [vmem:[#allocation8 + $0x38] sm:$0xff]  ;;  %s3465_s9 = sld [smem:[#allocation24_spill]]  ;;  %s1642_s21 = scalar_lea.sflag [#allocation4], %s3277_s16 }
  0xc1   : > { %2342 = vmatprep.subr.bf16.mxu0 %v2341_v3  ;;  %v2349_v8 = vpack.c.bf16 %v476_v7, %v475_v6  ;;  %v477_v10 = vld [vmem:[#allocation8 + $0x30] sm:$0xff]  ;;  %2030 = vmatprep.mubr.f32.mxu0 %v3304_v9  ;;  %v479_v13 = vld [vmem:[#allocation8 + $0x40] sm:$0xff]  ;;  %v480_v14 = vld [vmem:[#allocation8 + $0x48] sm:$0xff]  ;;  %s2890_s17 = scalar_lea.vmem %s3368_s24, 256  ;;  %s2978_s13 = smov [#allocation11]  }
  0xc2   : > { %2344 = vmatpush3.bf16.msra.mxu0 %v2341_v3  ;;  %2100 = vmatprep.mubr.f32.mxu1 %v3304_v9  ;;  %v2353_v12 = vpack.c.bf16 %v478_v11, %v477_v10  ;;  %v2357_v15 = vpack.c.bf16 %v480_v14, %v479_v13  ;;  %v481_v16 = vld [vmem:[#allocation8 + $0x50] sm:$0xff]  ;;  %v482_v17 = vld [vmem:[#allocation8 + $0x58] sm:$0xff]  ;;  %v483_v19 = vld [vmem:[#allocation8 + $0x60] sm:$0xff]  ;;  %p2891_p2 = scmp.ne.s32.totalorder %s3368_s24, %s2890_s17  ;;  %s2894_s18 = sshll.u32 %s2978_s13, 4  ;;  %s2895_s18 = int_to_ptr.vmem [resolvable:$false] %s2894_s18 }
  0xc3   : > { %2346 = vmatprep.subr.bf16.mxu0 %v2345_v5  ;;  %v2361_v18 = vpack.c.bf16 %v482_v17, %v481_v16  ;;  %v484_v20 = vld [vmem:[#allocation8 + $0x68] sm:$0xff]  ;;  %v485_v22 = vld [vmem:[#allocation8 + $0x70] sm:$0xff]  ;;  %v486_v23 = vld [vmem:[#allocation8 + $0x78] sm:$0xff]  ;;  %p2897_p8 = scmp.lt.s32.totalorder %s3368_s24, %s2895_s18 }
  0xc4   : > { %v2365_v21 = vpack.c.bf16 %v484_v20, %v483_v19  ;;  %v655_v24 = vld [vmem:[#allocation8 + $0x80] sm:$0xff]  ;;  %v656_v25 = vld [vmem:[#allocation8 + $0x88] sm:$0xff]  ;;  %v657_v26 = vld [vmem:[#allocation8 + $0x90] sm:$0xff]  ;;  %v2369_v30 = vpack.c.bf16 %v486_v23, %v485_v22  ;;  %p2892_p4 = pnand %p2891_p2, %p3185_p5 }
  0xc5   : > { %v658_v27 = vld [vmem:[#allocation8 + $0x98] sm:$0xff]  ;;  %v2405_v28 = vpack.c.bf16 %v656_v25, %v655_v24  ;;  %v659_v31 = vld [vmem:[#allocation8 + $0xa0] sm:$0xff]  ;;  %v660_v32 = vld [vmem:[#allocation8 + $0xa8] sm:$0xff] }
  0xc6   : > { %2348 = vmatpush3.bf16.msra.mxu0 %v2345_v5  ;;  %v2409_v29 = vpack.c.bf16 %v658_v27, %v657_v26  ;;  %v455_v33 = vld [vmem:[#allocation7] sm:$0xff]  ;;  %v456_v34 = vld [vmem:[#allocation7 + $0x8] sm:$0xff]  ;;  %v2413_v35 = vpack.c.bf16 %v660_v32, %v659_v31  ;;  %v457_v37 = vld [vmem:[#allocation7 + $0x10] sm:$0xff]  ;;  %p2893_p0 = pneg %p2892_p4 }
  0xc7   : > { %2350 = vmatprep.subr.bf16.mxu0 %v2349_v8  ;;  %2406 = vmatprep.subr.bf16.mxu1 %v2405_v28  ;;  %v2373_v36 = vpack.c.bf16 %v456_v34, %v455_v33  ;;  %v458_v38 = vld [vmem:[#allocation7 + $0x18] sm:$0xff]  ;;  %v661_v39 = vld [vmem:[#allocation8 + $0xb0] sm:$0xff]  ;;  %v663_v45 = vld [vmem:[#allocation8 + $0xc0] sm:$0xff] }
  0xc8   : > { %2408 = vmatpush3.bf16.msra.mxu1 %v2405_v28  ;;  %v662_v40 = vld [vmem:[#allocation8 + $0xb8] sm:$0xff]  ;;  %v2377_v42 = vpack.c.bf16 %v458_v38, %v457_v37  ;;  %v3314_v43 = vld [vmem:[%s373_s25] sm:$0xff]  ;;  %v664_v46 = vld [vmem:[#allocation8 + $0xc8] sm:$0xff] }
  0xc9   : > { %2410 = vmatprep.subr.bf16.mxu1 %v2409_v29  ;;  %v3310_v41 = vld [vmem:[%s382_s2 + $0x8] sm:$0xff]  ;;  %v2417_v44 = vpack.c.bf16 %v662_v40, %v661_v39  ;;  %v459_v47 = vld [vmem:[#allocation7 + $0x20] sm:$0xff]  ;;  %v2421_v49 = vpack.c.bf16 %v664_v46, %v663_v45  ;;  %v665_v51 = vld [vmem:[#allocation8 + $0xd0] sm:$0xff]  ;;  %s2896_s2 = scalar_lea.vmem %s2895_s18, 512 }
  0xca   : > { %2352 = vmatpush3.bf16.msra.mxu0 %v2349_v8  ;;  %v460_v48 = vld [vmem:[#allocation7 + $0x28] sm:$0xff]  ;;  %v666_v52 = vld [vmem:[#allocation8 + $0xd8] sm:$0xff]  ;;  %v461_v53 = vld [vmem:[#allocation7 + $0x30] sm:$0xff]  ;;  %p2898_p6 = scmp.lt.s32.totalorder %s2896_s2, %s2890_s17 }
  0xcb   : > { %2354 = vmatprep.subr.bf16.mxu0 %v2353_v12  ;;  %v2381_v50 = vpack.c.bf16 %v460_v48, %v459_v47  ;;  %v462_v54 = vld [vmem:[#allocation7 + $0x38] sm:$0xff]  ;;  %v2425_v55 = vpack.c.bf16 %v666_v52, %v665_v51  ;;  %v667_v57 = vld [vmem:[#allocation8 + $0xe0] sm:$0xff]  ;;  %v668_v58 = vld [vmem:[#allocation8 + $0xe8] sm:$0xff] }
  0xcc   : > { %2412 = vmatpush3.bf16.msra.mxu1 %v2409_v29  ;;  %v2385_v56 = vpack.c.bf16 %v462_v54, %v461_v53  ;;  %v463_v59 = vld [vmem:[#allocation7 + $0x40] sm:$0xff]  ;;  %v464_v60 = vld [vmem:[#allocation7 + $0x48] sm:$0xff]  ;;  %v2429_v61 = vpack.c.bf16 %v668_v58, %v667_v57  ;;  %v669_v63 = vld [vmem:[#allocation8 + $0xf0] sm:$0xff]  ;;  %p2899_p10 = por %p2898_p6, %p2897_p8 }
  0xcd   : > { %2414 = vmatprep.subr.bf16.mxu1 %v2413_v35  ;;  %v2389_v62 = vpack.c.bf16 %v464_v60, %v463_v59  ;;  %v670_v0 = vld [vmem:[#allocation8 + $0xf8] sm:$0xff]  ;;  %v465_v1 = vld [vmem:[#allocation7 + $0x50] sm:$0xff]  ;;  %v638_v5 = vld [vmem:[#allocation7 + $0x80] sm:$0xff] }
  0xce   : > { %2356 = vmatpush3.bf16.msra.mxu0 %v2353_v12  ;;  %v466_v2 = vld [vmem:[#allocation7 + $0x58] sm:$0xff]  ;;  %v2433_v3 = vpack.c.bf16 %v670_v0, %v669_v63  ;;  %v639_v6 = vld [vmem:[#allocation7 + $0x88] sm:$0xff]  ;;  %v467_v7 = vld [vmem:[#allocation7 + $0x60] sm:$0xff]  ;;  %p2900_p3 = pnand %p2899_p10, %p2893_p0 }
  0xcf   : > { %2358 = vmatprep.subr.bf16.mxu0 %v2357_v15  ;;  %v2393_v4 = vpack.c.bf16 %v466_v2, %v465_v1  ;;  %v468_v8 = vld [vmem:[#allocation7 + $0x68] sm:$0xff]  ;;  %v2437_v10 = vpack.c.bf16 %v639_v6, %v638_v5  ;;  %v640_v12 = vld [vmem:[#allocation7 + $0x90] sm:$0xff]  ;;  %v641_v13 = vld [vmem:[#allocation7 + $0x98] sm:$0xff] }
  0xd0   : > { %2416 = vmatpush3.bf16.msra.mxu1 %v2413_v35  ;;  %v2397_v11 = vpack.c.bf16 %v468_v8, %v467_v7  ;;  %v469_v14 = vld [vmem:[#allocation7 + $0x70] sm:$0xff]  ;;  %v2441_v16 = vpack.c.bf16 %v641_v13, %v640_v12  ;;  %v643_v19 = vld [vmem:[#allocation7 + $0xa8] sm:$0xff]  ;;  %v839_v20 = vld [vmem:[#allocation8 + $0x100] sm:$0xff] }
  0xd1   : > { %2418 = vmatprep.subr.bf16.mxu1 %v2417_v44  ;;  %v841_v24 = vld [vmem:[#allocation8 + $0x110] sm:$0xff]  ;;  %v842_v25 = vld [vmem:[#allocation8 + $0x118] sm:$0xff]  ;;  %v646_v31 = vld [vmem:[#allocation7 + $0xc0] sm:$0xff] }
  0xd2   : > { %2360 = vmatpush3.bf16.msra.mxu0 %v2357_v15  ;;  %v470_v15 = vld [vmem:[#allocation7 + $0x78] sm:$0xff]  ;;  %v644_v26 = vld [vmem:[#allocation7 + $0xb0] sm:$0xff]  ;;  %v2473_v29 = vpack.c.bf16 %v842_v25, %v841_v24  ;;  %v647_v32 = vld [vmem:[#allocation7 + $0xc8] sm:$0xff]  ;;  %v2977_v25 = vmov 0.0  }
  0xd3   : > { %2362 = vmatprep.subr.bf16.mxu0 %v2361_v18  ;;  %v2401_v17 = vpack.c.bf16 %v470_v15, %v469_v14  ;;  %v645_v27 = vld [vmem:[#allocation7 + $0xb8] sm:$0xff]  ;;  %v843_v33 = vld [vmem:[#allocation8 + $0x120] sm:$0xff]  ;;  %v844_v34 = vld [vmem:[#allocation8 + $0x128] sm:$0xff]  ;;  %v2453_v35 = vpack.c.bf16 %v647_v32, %v646_v31 }
  0xd4   : > { %2420 = vmatpush3.bf16.msra.mxu1 %v2417_v44  ;;  %v3322_v28 = vld [vmem:[%s373_s25 + $0x8] sm:$0xff]  ;;  %v648_v37 = vld [vmem:[#allocation7 + $0xd0] sm:$0xff]  ;;  %v650_v45 = vld [vmem:[#allocation7 + $0xe0] sm:$0xff]  ;;  %s3373_s25 = scalar_lea.hbm %s3465_s9, %s1819_s23 }
  0xd5   : > { %2422 = vmatprep.subr.bf16.mxu1 %v2421_v49  ;;  %v649_v38 = vld [vmem:[#allocation7 + $0xd8] sm:$0xff]  ;;  %v845_v39 = vld [vmem:[#allocation8 + $0x130] sm:$0xff]  ;;  %v651_v46 = vld [vmem:[#allocation7 + $0xe8] sm:$0xff] }
  0xd6   : > { %2364 = vmatpush3.bf16.msra.mxu0 %v2361_v18  ;;  %v642_v18 = vld [vmem:[#allocation7 + $0xa0] sm:$0xff]  ;;  %v846_v40 = vld [vmem:[#allocation8 + $0x138] sm:$0xff]  ;;  %v848_v48 = vld [vmem:[#allocation8 + $0x148] sm:$0xff] }
  0xd7   : > { %2366 = vmatprep.subr.bf16.mxu0 %v2365_v21  ;;  %v2445_v22 = vpack.c.bf16 %v643_v19, %v642_v18  ;;  %v2481_v44 = vpack.c.bf16 %v846_v40, %v845_v39  ;;  %v847_v47 = vld [vmem:[#allocation8 + $0x140] sm:$0xff]  ;;  %v850_v51 = vld [vmem:[#allocation8 + $0x158] sm:$0xff]  ;;  %v852_v54 = vld [vmem:[#allocation8 + $0x168] sm:$0xff] }
  0xd8   : > { %2424 = vmatpush3.bf16.msra.mxu1 %v2421_v49  ;;  %v2485_v49 = vpack.c.bf16 %v848_v48, %v847_v47  ;;  %v851_v53 = vld [vmem:[#allocation8 + $0x160] sm:$0xff]  ;;  %v854_v57 = vld [vmem:[#allocation8 + $0x178] sm:$0xff]  ;;  %v823_v60 = vld [vmem:[#allocation7 + $0x108] sm:$0xff] }
  0xd9   : > { %2426 = vmatprep.subr.bf16.mxu1 %v2425_v55  ;;  %v822_v59 = vld [vmem:[#allocation7 + $0x100] sm:$0xff]  ;;  %v825_v63 = vld [vmem:[#allocation7 + $0x118] sm:$0xff]  ;;  %v827_v2 = vld [vmem:[#allocation7 + $0x128] sm:$0xff] }
  0xda   : > { %2368 = vmatpush3.bf16.msra.mxu0 %v2365_v21  ;;  %v840_v21 = vld [vmem:[#allocation8 + $0x108] sm:$0xff]  ;;  %v826_v1 = vld [vmem:[#allocation7 + $0x120] sm:$0xff]  ;;  %v829_v5 = vld [vmem:[#allocation7 + $0x138] sm:$0xff] }
  0xdb   : > { %2370 = vmatprep.subr.bf16.mxu0 %v2369_v30  ;;  %v2469_v23 = vpack.c.bf16 %v840_v21, %v839_v20  ;;  %v830_v7 = vld [vmem:[#allocation7 + $0x140] sm:$0xff]  ;;  %v831_v8 = vld [vmem:[#allocation7 + $0x148] sm:$0xff]  ;;  %v833_v12 = vld [vmem:[#allocation7 + $0x158] sm:$0xff]  ;;  %v434_v21 = vlaneseq }
  0xdc   : > { %2428 = vmatpush3.bf16.msra.mxu1 %v2425_v55  ;;  %v2493_v55 = vpack.c.bf16 %v852_v54, %v851_v53  ;;  %v834_v13 = vld [vmem:[#allocation7 + $0x160] sm:$0xff]  ;;  %v835_v14 = vld [vmem:[#allocation7 + $0x168] sm:$0xff]  ;;  %v836_v15 = vld [vmem:[#allocation7 + $0x170] sm:$0xff] }
  0xdd   : > { %2430 = vmatprep.subr.bf16.mxu1 %v2429_v61  ;;  %v652_v18 = vld [vmem:[#allocation7 + $0xf0] sm:$0xff]  ;;  %v653_v19 = vld [vmem:[#allocation7 + $0xf8] sm:$0xff]  ;;  %v1288_v40 = vld [vmem:[#allocation10 + $0xa0] sm:$0xff] }
  0xde   : > { %2372 = vmatpush3.bf16.msra.mxu0 %v2369_v30  ;;  %v2449_v30 = vpack.c.bf16 %v645_v27, %v644_v26  ;;  %v2465_v20 = vpack.c.bf16 %v653_v19, %v652_v18  ;;  %v1292_v48 = vld [vmem:[#allocation10 + $0xc0] sm:$0xff]  ;;  %v1206_v18 = vld [vmem:[#allocation10 + $0x70] sm:$0xff]  ;;  %v1207_v19 = vld [vmem:[#allocation10 + $0x78] sm:$0xff] }
  0xdf   : > { %2374 = vmatprep.subr.bf16.mxu0 %v2373_v36 }
  0xe0   : > { %2432 = vmatpush3.bf16.msra.mxu1 %v2429_v61  ;;  %v2501_v61 = vpack.c.bf16 %v823_v60, %v822_v59 }
  0xe1   : > { %2031 = vmatmul.mubr.f32.vlgmr.msra.gmra.mrb[0].mxu0 %v3310_v41  ;;  %2434 = vmatprep.subr.bf16.mxu1 %v2433_v3 }
  0xe2   : > { %2376 = vmatpush3.bf16.msra.mxu0 %v2373_v36  ;;  %2065 = vmatprep.mubr.f32.mxu0 %v3314_v43  ;;  %v2477_v36 = vpack.c.bf16 %v844_v34, %v843_v33  ;;  %v1284_v34 = vld [vmem:[#allocation10 + $0x80] sm:$0xff] }
  0xe3   : > { %2378 = vmatprep.subr.bf16.mxu0 %v2377_v42 }
  0xe4   : > { %2436 = vmatpush3.bf16.msra.mxu1 %v2433_v3  ;;  %v2509_v3 = vpack.c.bf16 %v827_v2, %v826_v1  ;;  %v1196_v1 = vld [vmem:[#allocation10 + $0x20] sm:$0xff]  ;;  %v1197_v2 = vld [vmem:[#allocation10 + $0x28] sm:$0xff] }
  0xe5   : > { %2438 = vmatprep.subr.bf16.mxu1 %v2437_v10 }
  0xe6   : > { %2380 = vmatpush3.bf16.msra.mxu0 %v2377_v42  ;;  %v2457_v42 = vpack.c.bf16 %v649_v38, %v648_v37  ;;  %v1286_v37 = vld [vmem:[#allocation10 + $0x90] sm:$0xff]  ;;  %v1287_v38 = vld [vmem:[#allocation10 + $0x98] sm:$0xff] }
  0xe7   : > { %2382 = vmatprep.subr.bf16.mxu0 %v2381_v50  ;;  %2101 = vmatmul.mubr.f32.vlgmr.msra.gmra.mrb[0].mxu1 %v3310_v41  ;;  %v2613_v39 = vpack.c.bf16 %v1287_v38, %v1286_v37 }
  0xe8   : > { %2440 = vmatpush3.bf16.msra.mxu1 %v2437_v10  ;;  %2135 = vmatprep.mubr.f32.mxu1 %v3314_v43  ;;  %v2517_v10 = vpack.c.bf16 %v831_v8, %v830_v7  ;;  %v1200_v7 = vld [vmem:[#allocation10 + $0x40] sm:$0xff]  ;;  %v1201_v8 = vld [vmem:[#allocation10 + $0x48] sm:$0xff] }
  0xe9   : > { %2442 = vmatprep.subr.bf16.mxu1 %v2441_v16 }
  0xea   : > { %2384 = vmatpush3.bf16.msra.mxu0 %v2381_v50  ;;  %v849_v50 = vld [vmem:[#allocation8 + $0x150] sm:$0xff] }
  0xeb   : > { %2386 = vmatprep.subr.bf16.mxu0 %v2385_v56  ;;  %v2489_v52 = vpack.c.bf16 %v850_v51, %v849_v50  ;;  %v1294_v50 = vld [vmem:[#allocation10 + $0xd0] sm:$0xff]  ;;  %v1295_v51 = vld [vmem:[#allocation10 + $0xd8] sm:$0xff] }
  0xec   : > { %2444 = vmatpush3.bf16.msra.mxu1 %v2441_v16  ;;  %v837_v16 = vld [vmem:[#allocation7 + $0x178] sm:$0xff] }
  0xed   : > { %2446 = vmatprep.subr.bf16.mxu1 %v2445_v22 }
  0xee   : > { %2388 = vmatpush3.bf16.msra.mxu0 %v2385_v56  ;;  %v853_v56 = vld [vmem:[#allocation8 + $0x170] sm:$0xff] }
  0xef   : > { %2390 = vmatprep.subr.bf16.mxu0 %v2389_v62  ;;  %v2497_v58 = vpack.c.bf16 %v854_v57, %v853_v56  ;;  %v1192_v56 = vld [vmem:[#allocation10] sm:$0xff]  ;;  %v1193_v57 = vld [vmem:[#allocation10 + $0x8] sm:$0xff] }
  0xf0   : > { %2448 = vmatpush3.bf16.msra.mxu1 %v2445_v22  ;;  %v435_v22 = vshrl.u32 %v434_v21, 7 }
  0xf1   : > { %2450 = vmatprep.subr.bf16.mxu1 %v2449_v30 }
  0xf2   : > { %2392 = vmatpush3.bf16.msra.mxu0 %v2389_v62  ;;  %v824_v62 = vld [vmem:[#allocation7 + $0x110] sm:$0xff]  ;;  %v1798_v24 = vadd.s32 4294967295, %v435_v22  ;;  %v436_v27 = vadd.s32 8, %v435_v22  ;;  %v445_v31 = vadd.s32 1, %v435_v22  ;;  %v1299_v22 = vld [vmem:[#allocation10 + $0xf8] sm:$0xff] }
  0xf3   : > { %2394 = vmatprep.subr.bf16.mxu0 %v2393_v4  ;;  %v2505_v0 = vpack.c.bf16 %v825_v63, %v824_v62  ;;  %v1194_v62 = vld [vmem:[#allocation10 + $0x10] sm:$0xff]  ;;  %v1195_v63 = vld [vmem:[#allocation10 + $0x18] sm:$0xff] }
  0xf4   : > { %2452 = vmatpush3.bf16.msra.mxu1 %v2449_v30  ;;  %v446_v32 = vadd.s32 1, %v436_v27 }
  0xf5   : > { %2454 = vmatprep.subr.bf16.mxu1 %v2453_v35 }
  0xf6   : > { %2396 = vmatpush3.bf16.msra.mxu0 %v2393_v4  ;;  %v828_v4 = vld [vmem:[#allocation7 + $0x130] sm:$0xff] }
  0xf7   : > { %2398 = vmatprep.subr.bf16.mxu0 %v2397_v11  ;;  %v2513_v6 = vpack.c.bf16 %v829_v5, %v828_v4  ;;  %v1198_v4 = vld [vmem:[#allocation10 + $0x30] sm:$0xff]  ;;  %v1199_v5 = vld [vmem:[#allocation10 + $0x38] sm:$0xff] }
  0xf8   : > { %2456 = vmatpush3.bf16.msra.mxu1 %v2453_v35  ;;  %v1285_v35 = vld [vmem:[#allocation10 + $0x88] sm:$0xff] }
  0xf9   : > { %2458 = vmatprep.subr.bf16.mxu1 %v2457_v42 }
  0xfa   : > { %2400 = vmatpush3.bf16.msra.mxu0 %v2397_v11  ;;  %v832_v11 = vld [vmem:[#allocation7 + $0x150] sm:$0xff] }
  0xfb   : > { %2402 = vmatprep.subr.bf16.mxu0 %v2401_v17 }
  0xfc   : > { %2460 = vmatpush3.bf16.msra.mxu1 %v2457_v42  ;;  %v1289_v42 = vld [vmem:[#allocation10 + $0xa8] sm:$0xff] }
  0xfe   : > { %2404 = vmatpush3.bf16.msra.mxu0 %v2401_v17  ;;  %v2529_v17 = vpack.c.bf16 %v837_v16, %v836_v15  ;;  %v1296_v15 = vld [vmem:[#allocation10 + $0xe0] sm:$0xff]  ;;  %v1297_v16 = vld [vmem:[#allocation10 + $0xe8] sm:$0xff] }
  0xff   : > { %2470 = vmatprep.subr.bf16.mxu0 %v2469_v23 }
 0x101   : > { %2066 = vmatmul.mubr.f32.vlgmr.msra.gmra.mrb[0].mxu0 %v3322_v28 }
 0x102   : > { %2472 = vmatpush3.bf16.msra.mxu0 %v2469_v23  ;;  %2170 = vmatprep.mubr.f32.mxu0 %v3304_v9  ;;  %v2461_v9 = vpack.c.bf16 %v651_v46, %v650_v45  ;;  %v438_v23 = vand.u32 127, %v434_v21  ;;  %v1290_v45 = vld [vmem:[#allocation10 + $0xb0] sm:$0xff]  ;;  %v1291_v46 = vld [vmem:[#allocation10 + $0xb8] sm:$0xff] }
 0x103   : > { %2474 = vmatprep.subr.bf16.mxu0 %v2473_v29  ;;  %v2621_v47 = vpack.c.bf16 %v1291_v46, %v1290_v45  ;;  %v1298_v21 = vld [vmem:[#allocation10 + $0xf0] sm:$0xff]  ;;  %v1305_v46 = vld [vmem:[#allocation10 + $0x120] sm:$0xff] }
 0x104   : > { %2462 = vmatprep.subr.bf16.mxu1 %v2461_v9  ;;  %vm441_vm1 = vcmp.eq.s32.totalorder %v438_v23, %v1798_v24  ;;  %vm447_vm3 = vcmp.eq.s32.totalorder %v438_v23, %v445_v31  ;;  %vm448_vm4 = vcmp.eq.s32.totalorder %v438_v23, %v446_v32  ;;  %v1301_v24 = vld [vmem:[#allocation10 + $0x100] sm:$0xff] }
 0x105   : > { %2464 = vmatpush3.bf16.msra.mxu1 %v2461_v9  ;;  %v3330_v26 = vsel %vm441_vm1, 1.0, %v2977_v25  ;;  %v3338_v33 = vsel %vm448_vm4, 1.0, %v2977_v25  ;;  %v1293_v9 = vld [vmem:[#allocation10 + $0xc8] sm:$0xff]  ;;  %v1805_v32 = vld [vmem:[%s3423_s6] ss:$0 sm:$0xff] }
 0x106   : > { %2476 = vmatpush3.bf16.msra.mxu0 %v2473_v29  ;;  %2466 = vmatprep.subr.bf16.mxu1 %v2465_v20  ;;  %v1799_v29 = vadd.s32 4294967295, %v436_v27 }
 0x107   : > { %2478 = vmatprep.subr.bf16.mxu0 %v2477_v36 }
 0x108   : > { %vm442_vm2 = vcmp.eq.s32.totalorder %v438_v23, %v1799_v29  ;;  %v2637_v23 = vpack.c.bf16 %v1299_v22, %v1298_v21  ;;  %v1804_v29 = vld [vmem:[%s3422_s5] ss:$0 sm:$0xff] }
 0x109   : > { %2468 = vmatpush3.bf16.msra.mxu1 %v2465_v20  ;;  %v3334_v30 = vsel %vm442_vm2, 1.0, %v2977_v25  ;;  %v2569_v20 = vpack.c.bf16 %v1207_v19, %v1206_v18 }
 0x10a   : > { %2480 = vmatpush3.bf16.msra.mxu0 %v2477_v36  ;;  %v2609_v36 = vpack.c.bf16 %v1285_v35, %v1284_v34 }
 0x10b   : > { %2482 = vmatprep.subr.bf16.mxu0 %v2481_v44 }
 0x10c   : > { %2136 = vmatmul.mubr.f32.vlgmr.msra.gmra.mrb[0].mxu1 %v3322_v28 }
 0x10d   : > { %2212 = vmatprep.mubr.msk.f32.mxu1 %vm1005_vm0, %v3330_v26 }
 0x10e   : > { %2484 = vmatpush3.bf16.msra.mxu0 %v2481_v44  ;;  %v2617_v44 = vpack.c.bf16 %v1289_v42, %v1288_v40  ;;  %v1304_v40 = vld [vmem:[#allocation10 + $0x118] sm:$0xff] }
 0x10f   : > { %2486 = vmatprep.subr.bf16.mxu0 %v2485_v49 }
 0x112   : > { %2488 = vmatpush3.bf16.msra.mxu0 %v2485_v49  ;;  %v2625_v49 = vpack.c.bf16 %v1293_v9, %v1292_v48  ;;  %v1307_v9 = vld [vmem:[#allocation10 + $0x130] sm:$0xff] }
 0x113   : > { %2490 = vmatprep.subr.bf16.mxu0 %v2489_v52 }
 0x116   : > { %2492 = vmatpush3.bf16.msra.mxu0 %v2489_v52  ;;  %v2629_v52 = vpack.c.bf16 %v1295_v51, %v1294_v50  ;;  %v1309_v51 = vld [vmem:[#allocation10 + $0x140] sm:$0xff] }
 0x117   : > { %2494 = vmatprep.subr.bf16.mxu0 %v2493_v55 }
 0x11a   : > { %2496 = vmatpush3.bf16.msra.mxu0 %v2493_v55 }
 0x11b   : > { %2498 = vmatprep.subr.bf16.mxu0 %v2497_v58 }
 0x11e   : > { %2500 = vmatpush3.bf16.msra.mxu0 %v2497_v58 }
 0x11f   : > { %2502 = vmatprep.subr.bf16.mxu0 %v2501_v61 }
 0x121   : > { %2171 = vmatmul.mubr.f32.vlgmr.msra.gmra.mrb[2].mxu0 %v3310_v41  ;;  %v2521_v41 = vpack.c.bf16 %v833_v12, %v832_v11  ;;  %v1202_v11 = vld [vmem:[#allocation10 + $0x50] sm:$0xff]  ;;  %v1203_v12 = vld [vmem:[#allocation10 + $0x58] sm:$0xff] }
 0x122   : > { %2504 = vmatpush3.bf16.msra.mxu0 %v2501_v61  ;;  %2205 = vmatprep.mubr.f32.mxu0 %v3314_v43  ;;  %v2525_v43 = vpack.c.bf16 %v835_v14, %v834_v13  ;;  %v2541_v61 = vpack.c.bf16 %v1193_v57, %v1192_v56  ;;  %v1204_v13 = vld [vmem:[#allocation10 + $0x60] sm:$0xff]  ;;  %v1205_v14 = vld [vmem:[#allocation10 + $0x68] sm:$0xff] }
 0x123   : > { %2506 = vmatprep.subr.bf16.mxu0 %v2505_v0  ;;  %v1313_v57 = vld [vmem:[#allocation10 + $0x160] sm:$0xff] }
 0x126   : > { %2508 = vmatpush3.bf16.msra.mxu0 %v2505_v0  ;;  %v2545_v0 = vpack.c.bf16 %v1195_v63, %v1194_v62 }
 0x127   : > { %2510 = vmatprep.subr.bf16.mxu0 %v2509_v3 }
 0x12a   : > { %2512 = vmatpush3.bf16.msra.mxu0 %v2509_v3  ;;  %v2549_v3 = vpack.c.bf16 %v1197_v2, %v1196_v1 }
 0x12b   : > { %2514 = vmatprep.subr.bf16.mxu0 %v2513_v6 }
 0x12e   : > { %2516 = vmatpush3.bf16.msra.mxu0 %v2513_v6  ;;  %v2553_v6 = vpack.c.bf16 %v1199_v5, %v1198_v4 }
 0x12f   : > { %2518 = vmatprep.subr.bf16.mxu0 %v2517_v10 }
 0x132   : > { %2520 = vmatpush3.bf16.msra.mxu0 %v2517_v10  ;;  %v2557_v10 = vpack.c.bf16 %v1201_v8, %v1200_v7 }
 0x133   : > { %2522 = vmatprep.subr.bf16.mxu0 %v2521_v41 }
 0x136   : > { %2524 = vmatpush3.bf16.msra.mxu0 %v2521_v41  ;;  %v2561_v41 = vpack.c.bf16 %v1203_v12, %v1202_v11 }
 0x137   : > { %2526 = vmatprep.subr.bf16.mxu0 %v2525_v43 }
 0x13a   : > { %2528 = vmatpush3.bf16.msra.mxu0 %v2525_v43  ;;  %v2565_v43 = vpack.c.bf16 %v1205_v14, %v1204_v13 }
 0x13b   : > { %2530 = vmatprep.subr.bf16.mxu0 %v2529_v17 }
 0x13e   : > { %2532 = vmatpush3.bf16.msra.mxu0 %v2529_v17  ;;  %v2633_v17 = vpack.c.bf16 %v1297_v16, %v1296_v15 }
 0x13f   : > { %2610 = vmatprep.subr.bf16.mxu0 %v2609_v36 }
 0x141   : > { %2206 = vmatmul.mubr.f32.vlgmr.msra.gmra.mrb[2].mxu0 %v3322_v28  ;;  %v3336_v28 = vsel %vm447_vm3, 1.0, %v2977_v25  ;;  %v1302_v25 = vld [vmem:[#allocation10 + $0x108] sm:$0xff] }
 0x142   : > { %2612 = vmatpush3.bf16.msra.mxu0 %v2609_v36  ;;  %v2573_v27 = vpack.c.bf16 %v1302_v25, %v1301_v24 }
 0x143   : > { %2614 = vmatprep.subr.bf16.mxu0 %v2613_v39 }
 0x146   : > { %2616 = vmatpush3.bf16.msra.mxu0 %v2613_v39  ;;  %v1303_v39 = vld [vmem:[#allocation10 + $0x110] sm:$0xff] }
 0x147   : > { %2618 = vmatprep.subr.bf16.mxu0 %v2617_v44  ;;  %v2577_v45 = vpack.c.bf16 %v1304_v40, %v1303_v39 }
 0x14a   : > { %2620 = vmatpush3.bf16.msra.mxu0 %v2617_v44 }
 0x14b   : > { %2622 = vmatprep.subr.bf16.mxu0 %v2621_v47 }
 0x14e   : > { %2624 = vmatpush3.bf16.msra.mxu0 %v2621_v47  ;;  %v1306_v47 = vld [vmem:[#allocation10 + $0x128] sm:$0xff] }
 0x14f   : > { %2626 = vmatprep.subr.bf16.mxu0 %v2625_v49  ;;  %v2581_v48 = vpack.c.bf16 %v1306_v47, %v1305_v46 }
 0x152   : > { %2628 = vmatpush3.bf16.msra.mxu0 %v2625_v49  ;;  %v1308_v49 = vld [vmem:[#allocation10 + $0x138] sm:$0xff] }
 0x153   : > { %2630 = vmatprep.subr.bf16.mxu0 %v2629_v52  ;;  %v2585_v50 = vpack.c.bf16 %v1308_v49, %v1307_v9 }
 0x156   : > { %2632 = vmatpush3.bf16.msra.mxu0 %v2629_v52  ;;  %v1310_v52 = vld [vmem:[#allocation10 + $0x148] sm:$0xff] }
 0x157   : > { %2634 = vmatprep.subr.bf16.mxu0 %v2633_v17 }
 0x15a   : > { %2636 = vmatpush3.bf16.msra.mxu0 %v2633_v17 }
 0x15b   : > { %2638 = vmatprep.subr.bf16.mxu0 %v2637_v23 }
 0x15e   : > { %2640 = vmatpush3.bf16.msra.mxu0 %v2637_v23 }
 0x1d4   : > { %v2067_v53 = vpop.f32.mrb[0].mxu0 }
 0x1d5   : > { %v628_v54 = vpop.f32.mrb[1].mxu0 }
 0x1d6   : > { %v2533_v55 = vpack.c.bf16 %v2067_v53, %v628_v54  ;;  %v2589_v53 = vpack.c.bf16 %v1310_v52, %v1309_v51  ;;  %v1311_v54 = vld [vmem:[#allocation10 + $0x150] sm:$0xff] }
 0x1d8   : > { %2534 = vmatprep.subr.bf16.mxu1 %v2533_v55 }
 0x1d9   : > { %2536 = vmatpush3.bf16.msra.mxu1 %v2533_v55  ;;  %v1312_v55 = vld [vmem:[#allocation10 + $0x158] sm:$0xff] }
 0x1da   : > { %v2593_v56 = vpack.c.bf16 %v1312_v55, %v1311_v54 }
 0x1dc   : > { %2213 = vmatmul.mubr.msk.f32.vlgmr.msra.gmra.mrb[0].mxu1 %vm1005_vm0, %v3334_v30 }
 0x1dd   : > { %2219 = vmatprep.mubr.msk.f32.mxu1 %vm1005_vm0, %v3336_v28 }
 0x214   : > { %v2207_v58 = vpop.f32.mrb[2].mxu0 }
 0x215   : > { %v996_v59 = vpop.f32.mrb[3].mxu0 }
 0x216   : > { %v2537_v60 = vpack.c.bf16 %v2207_v58, %v996_v59  ;;  %v1314_v58 = vld [vmem:[#allocation10 + $0x168] sm:$0xff] }
 0x217   : > { %v2597_v59 = vpack.c.bf16 %v1314_v58, %v1313_v57 }
 0x218   : > { %2538 = vmatprep.subr.bf16.mxu1 %v2537_v60 }
 0x219   : > { %2540 = vmatpush3.bf16.msra.mxu1 %v2537_v60  ;;  %v1315_v60 = vld [vmem:[#allocation10 + $0x170] sm:$0xff] }
 0x21a   : > { %2542 = vmatprep.subr.bf16.mxu1 %v2541_v61 }
 0x21c   : > { %2220 = vmatmul.mubr.msk.f32.vlgmr.msra.gmra.mrb[0].mxu1 %vm1005_vm0, %v3338_v33 }
 0x21d   : > { %2544 = vmatpush3.bf16.msra.mxu1 %v2541_v61  ;;  %v1316_v61 = vld [vmem:[#allocation10 + $0x178] sm:$0xff] }
 0x21e   : > { %2546 = vmatprep.subr.bf16.mxu1 %v2545_v0  ;;  %v2601_v62 = vpack.c.bf16 %v1316_v61, %v1315_v60 }
 0x221   : > { %2548 = vmatpush3.bf16.msra.mxu1 %v2545_v0 }
 0x222   : > { %2550 = vmatprep.subr.bf16.mxu1 %v2549_v3 }
 0x225   : > { %2552 = vmatpush3.bf16.msra.mxu1 %v2549_v3 }
 0x226   : > { %2554 = vmatprep.subr.bf16.mxu1 %v2553_v6 }
 0x229   : > { %2556 = vmatpush3.bf16.msra.mxu1 %v2553_v6 }
 0x22a   : > { %2558 = vmatprep.subr.bf16.mxu1 %v2557_v10 }
 0x22d   : > { %2560 = vmatpush3.bf16.msra.mxu1 %v2557_v10 }
 0x22e   : > { %2562 = vmatprep.subr.bf16.mxu1 %v2561_v41 }
 0x231   : > { %2564 = vmatpush3.bf16.msra.mxu1 %v2561_v41  ;;  %v1811_v41 = vld [vmem:[%s3425_s8] ss:$0 sm:$0xff] }
 0x232   : > { %2566 = vmatprep.subr.bf16.mxu1 %v2565_v43 }
 0x235   : > { %2568 = vmatpush3.bf16.msra.mxu1 %v2565_v43 }
 0x236   : > { %2570 = vmatprep.subr.bf16.mxu1 %v2569_v20 }
 0x239   : > { %2572 = vmatpush3.bf16.msra.mxu1 %v2569_v20 }
 0x23a   : > { %2574 = vmatprep.subr.bf16.mxu1 %v2573_v27 }
 0x2ef   : > { %v2221_v31 = vpop.f32.mrb[0].mxu1 }
 0x2f0   : > { %v1180_v34 = vmul.f32 %v2221_v31, %v1804_v29  ;;  %v1161_v35 = vpop.f32.mrb[1].mxu1 }
 0x2f1   : > { %v1179_v36 = vmul.f32 %v1804_v29, %v1161_v35 }
 0x2f2   : > { %v1189_v37 = vadd.f32 %v1805_v32, %v1180_v34 }
 0x2f3   : > { %v1188_v38 = vadd.f32 %v1805_v32, %v1179_v36 }
 0x2f4   : > { %v1191_v44 = vmax.f32 %v1189_v37, 0.0 }
 0x2f5   : > { %v1190_v42 = vmax.f32 %v1188_v38, 0.0 }
 0x2f7   : > { %2254 = vmatprep.mubr.f32.mxu1 %v1190_v42  ;;  %2331 = vmatprep.mubr.f32.mxu0 %v1190_v42 }
 0x2f8   : > { %2255 = vmatmul.mubr.f32.vlgmr.msra.gmra.mrb[2].mxu1 %v1191_v44  ;;  %2332 = vmatmul.mubr.f32.vlgmr.msra.gmra.mrb[4].mxu0 %v1191_v44 }
 0x2f9   : > { %2576 = vmatpush3.bf16.msra.mxu1 %v2573_v27  ;;  %2289 = vmatprep.mubr.f32.mxu1 %v1190_v42 }
 0x2fa   : > { %2578 = vmatprep.subr.bf16.mxu1 %v2577_v45 }
 0x2fd   : > { %2580 = vmatpush3.bf16.msra.mxu1 %v2577_v45 }
 0x2fe   : > { %2582 = vmatprep.subr.bf16.mxu1 %v2581_v48 }
 0x301   : > { %2584 = vmatpush3.bf16.msra.mxu1 %v2581_v48 }
 0x302   : > { %2586 = vmatprep.subr.bf16.mxu1 %v2585_v50 }
 0x305   : > { %2588 = vmatpush3.bf16.msra.mxu1 %v2585_v50 }
 0x306   : > { %2590 = vmatprep.subr.bf16.mxu1 %v2589_v53 }
 0x309   : > { %2592 = vmatpush3.bf16.msra.mxu1 %v2589_v53 }
 0x30a   : > { %2594 = vmatprep.subr.bf16.mxu1 %v2593_v56 }
 0x30d   : > { %2596 = vmatpush3.bf16.msra.mxu1 %v2593_v56 }
 0x30e   : > { %2598 = vmatprep.subr.bf16.mxu1 %v2597_v59 }
 0x311   : > { %2600 = vmatpush3.bf16.msra.mxu1 %v2597_v59 }
 0x312   : > { %2602 = vmatprep.subr.bf16.mxu1 %v2601_v62 }
 0x315   : > { %2604 = vmatpush3.bf16.msra.mxu1 %v2601_v62 }
 0x318   : > { %2290 = vmatmul.mubr.f32.vlgmr.msra.gmra.mrb[4].mxu1 %v1191_v44 }
 0x319   : > { %2296 = vmatprep.mubr.msk.f32.mxu1 %vm1005_vm0, %v3330_v26 }
 0x3cb   : > { %v2256_v63 = vpop.f32.mrb[2].mxu1  ;;  %v2333_v0 = vpop.f32.mrb[4].mxu0 }
 0x3cc   : > { %v1274_v1 = vpop.f32.mrb[3].mxu1  ;;  %v1533_v2 = vpop.f32.mrb[5].mxu0 }
 0x3cd   : > { %v2605_v3 = vpack.c.bf16 %v2256_v63, %v1274_v1 }
 0x3cf   : > { %2606 = vmatprep.subr.bf16.mxu1 %v2605_v3 }
 0x3d0   : > { %2608 = vmatpush3.bf16.msra.mxu1 %v2605_v3 }
 0x3d3   : > { %2297 = vmatmul.mubr.msk.f32.vlgmr.msra.gmra.mrb[6].mxu1 %vm1005_vm0, %v3334_v30  ;;  %v1810_v30 = vld [vmem:[%s3424_s7] ss:$0 sm:$0xff] }
 0x3d4   : > { %2338 = vmatprep.mubr.msk.f32.mxu1 %vm1005_vm0, %v3336_v28 }
 0x3eb   : > { %v2291_v4 = vpop.f32.mrb[4].mxu1 }
 0x3ec   : > { %v1383_v5 = vpop.f32.mrb[5].mxu1 }
 0x3ed   : > { %v2641_v6 = vpack.c.bf16 %v2291_v4, %v1383_v5 }
 0x3ef   : > { %2642 = vmatprep.subr.bf16.mxu1 %v2641_v6 }
 0x3f0   : > { %2644 = vmatpush3.bf16.msra.mxu1 %v2641_v6 }
 0x3f3   : > { %2339 = vmatmul.mubr.msk.f32.vlgmr.msra.gmra.mrb[8].mxu1 %vm1005_vm0, %v3338_v33 }
 0x4a6   : > { %v2298_v26 = vpop.f32.mrb[6].mxu1 }
 0x4a7   : > { %v1539_v7 = vadd.f32 %v2333_v0, %v2298_v26  ;;  %v1458_v8 = vpop.f32.mrb[7].mxu1 }
 0x4a8   : > { %v1534_v10 = vadd.f32 %v1533_v2, %v1458_v8 }
 0x4c6   : > { %v2340_v11 = vpop.f32.mrb[8].mxu1 }
 0x4c7   : > { %v1618_v28 = vadd.f32 %v2340_v11, %v1539_v7  ;;  %v1608_v12 = vpop.f32.mrb[9].mxu1 }
 0x4c8   : > { %v1617_v13 = vadd.f32 %v1608_v12, %v1534_v10 }
 0x4c9   : > { %v1627_v14 = vmul.f32 %v1810_v30, %v1618_v28 }
 0x4ca   : > { %v1626_v33 = vmul.f32 %v1810_v30, %v1617_v13 }
 0x4cb   : > { %v1636_v43 = vadd.f32 %v1811_v41, %v1627_v14 }
 0x4cc   : > { %v1635_v15 = vadd.f32 %v1811_v41, %v1626_v33 }
 0x4cd   : > { %v1638_v16 = vmax.f32 %v1636_v43, 0.0 }
 0x4ce   : > { %v1637_v17 = vmax.f32 %v1635_v15, 0.0 }
 0x4cf   : > { %1640 = vst [vmem:[%s433_s3 + $0x8] sm:$0xff] %v1638_v16 }
 0x4d0   : > { %1639 = vst [vmem:[%s433_s3] sm:$0xff] %v1637_v17 }
 0x4d1   : > { %2903 = shalt.err (!%p2900_p3)
}
 0x4d2   : > { %s2904_s15 = scalar_lea.hbm %s3373_s25, 256  ;;  %s2908_s30 = scalar_lea.hbm %s3465_s9, 512 }
 0x4d3   : > { %p2905_p9 = scmp.ne.s32.totalorder %s3373_s25, %s2904_s15  ;;  %p2909_p7 = scmp.lt.u32.totalorder %s3373_s25, %s3465_s9 }
 0x4d4   : > { %p2910_p12 = scmp.lt.u32.totalorder %s2908_s30, %s2904_s15  ;;  %p2912_p2 = scmp.lt.u32.totalorder %s2904_s15, %s3373_s25 }
 0x4d5   : > { %p2906_p13 = pnand %p2905_p9, %p3185_p5 }
 0x4d6   : > { %p2911_p1 = por %p2910_p12, %p2909_p7 }
 0x4d7   : > { %p2907_p11 = pneg %p2906_p13 }
 0x4d8   : > { %p2913_p4 = por %p2912_p2, %p2911_p1 }
 0x4da   : > { %p2914_p0 = pnand %p2913_p4, %p2907_p11 }
 0x4dc   : > { %2917 = shalt.err (!%p2914_p0)
}
 0x4dd   : > { %s2979_s26 = smov 128   ;;  %s2980_s29 = smov 8  }
 0x4de   : > { %2675 = dma.vmem_to_hbm [thread:$0]  (%p3185_p5), %s3368_s24, 256, %s3373_s25, %s1642_s21, %s2979_s26, %s2979_s26, %s2980_s29  }
 0x4df PF: > { %s3466_s3 = sld [smem:[#allocation17_spill]]  ;;  %s3467_s23 = sld [smem:[#allocation18_spill]] }
 0x4e0   : > { %p3469_p6 = scmp.ge.s32.totalorder %s2968_s12, 2 }
 0x4e5   : > { %s1670_s22 = sand.u32 1, %s3466_s3   ;;  %p3468_p8 = scmp.ne.s32.totalorder %s3467_s23, 0 }
 0x4e6   : > { %s1671_s0 = scalar_lea.sflag [#allocation4], %s1670_s22 }
 0x4e7   : > { %p2695_p10 = pnand %p3469_p6, %p3468_p8 }
 0x4e9   : > { %2951 = dma.done.wait (!%p2695_p10), %s1671_s0, 256  }
 0x4ea   : > { %2953 = vsyncadd (!%p2695_p10), %s1671_s0, 4294967040  ;;  %s3470_s17 = sld [smem:[#allocation19_spill]]  ;;  %p26_p3 = scmp.ge.s32.totalorder %s3171_s14, 4  }
 0x4eb   : > { %s3471_s30 = smov %s2960_s10  ;;  %s3472_s10 = smov %s2964_s11 }
 0x4ec   : > { %s3474_s12 = smov %s3171_s14  ;;  %28 = sbr.rel (!%p26_p3) target bundleno = 14 (0xe), region = 132 }
 0x4f0   : > { %s3473_s11 = smov %s3470_s17 }
 0x4f3   :  { %1676 = vsyncpa [#allocation3], 1 }
 0x4f4   :  { %1678 = vsyncpa [#allocation3 + $0x1], 1 }
 0x4f5   :  { %1679 = vsyncpa [#allocation6], 1 }
 0x4f6   :  { %1681 = vsyncpa [#allocation6 + $0x1], 1 }
 0x4f7   :  { %1682 = vsyncpa [#allocation9], 1 }
 0x4f8   :  { %1683 = vsyncpa [#allocation4], 1 }
 0x4f9   :  { %1685 = vsyncpa [#allocation4 + $0x1], 1 }

</bundles_post_ra>
